<compile_context>
chip_gen: v5e
topology: v5e:2x2
jax: 0.10.0
libtpu: 0.0.40
codegen_flags: <defaults>
</compile_context>

<pallas_src>
import jax
import jax.numpy as jnp
from jax.experimental import pallas as pl
from jax.experimental.pallas import tpu as pltpu  # noqa: F401  (TPU backend)

# ---------------- config (small, consistent with the module) ----------------
BATCH = 2
SEQ = 8
HIDDEN = 32
NUM_HEADS = 4
HEAD_DIM = HIDDEN // NUM_HEADS
INTERMEDIATE = 64
NUM_LAYERS = 2
VOCAB = 50
MAX_POS = 16
EPS = 1e-12
SCALE = HIDDEN ** (-0.5)      # MHSA uses input_dim ** -0.5 (matches the reference module)
NEG_BIAS = -1e9               # finite "-inf" for masked keys (exp underflows to 0 in fp32)


# ------------------------------ kernel helpers -------------------------------
def _layernorm(x, g, b):
    """LayerNorm over the last axis (biased variance, like torch)."""
    mean = jnp.mean(x, axis=-1, keepdims=True)
    cent = x - mean
    var = jnp.mean(cent * cent, axis=-1, keepdims=True)
    return cent * jax.lax.rsqrt(var + EPS) * g + b


def _gelu_exact(x):
    """Exact (erf) GELU, matching nn.GELU() defaults."""
    return 0.5 * x * (1.0 + jax.lax.erf(x * jnp.float32(0.7071067811865476)))


# ------------------------------ fused Pallas kernel ---------------------------
def _bert_kernel(emb_ref, bias_ref, eg_ref, eb_ref,
                 wq_ref, wk_ref, wv_ref, aw_ref, ab_ref,
                 alg_ref, alb_ref,
                 f1w_ref, f1b_ref, f2w_ref, f2b_ref,
                 olg_ref, olb_ref,
                 layer_out_ref, layer_ffn_ref):
    """Whole forward pass for all layers.

    emb_ref:  (B*S, H)           word+position embeddings (pre-LayerNorm)
    bias_ref: (B, S, S)          fully-broadcast additive attention bias (0 / -1e9)
    weights:  stacked over (layer[, head]) — indexed with static ref indices.
    layer_out_ref / layer_ffn_ref: (L, B*S, H)
    """
    R = BATCH * SEQ
    bias = bias_ref[...]                                   # (B, S, S), hoisted once

    # Embedding LayerNorm (dropout = identity).
    x = _layernorm(emb_ref[...], eg_ref[...], eb_ref[...])  # (R, H)

    for l in range(NUM_LAYERS):
        # ---------------- MHSA ----------------
        # All-head projections: one MXU matmul each (weights concat head-wise on lanes).
        # Softmax scale folded into q_all (single VPU mul instead of per-head).
        q_all = jnp.dot(x, wq_ref[l], preferred_element_type=jnp.float32) * jnp.float32(SCALE)
        k_all = jnp.dot(x, wk_ref[l], preferred_element_type=jnp.float32)
        v_all = jnp.dot(x, wv_ref[l], preferred_element_type=jnp.float32)

        att = jnp.zeros((R, HIDDEN), jnp.float32)
        for h in range(NUM_HEADS):
            lo = h * HEAD_DIM                               # static lane slice per head
            qb = q_all[:, lo:lo + HEAD_DIM].reshape(BATCH, SEQ, HEAD_DIM)
            kb = k_all[:, lo:lo + HEAD_DIM].reshape(BATCH, SEQ, HEAD_DIM)
            vb = v_all[:, lo:lo + HEAD_DIM].reshape(BATCH, SEQ, HEAD_DIM)

            # Batched score matmul contracting over D (no explicit k.T transpose).
            s = jnp.einsum('bqd,bkd->bqk', qb, kb,
                           preferred_element_type=jnp.float32)
            s = s + bias                                    # additive mask (pre-broadcast, finite)
            s = s - jnp.max(s, axis=-1, keepdims=True)
            p = jnp.exp(s)
            p = p * pl.reciprocal(jnp.sum(p, axis=-1, keepdims=True), approx=True)

            ctx = jnp.einsum('bqk,bkd->bqd', p, vb,
                             preferred_element_type=jnp.float32)               # (B, S, D)
            # Fold the dense output projection: dense(concat_h ctx_h) = sum_h ctx_h @ W[h]
            att = att + jnp.dot(ctx.reshape(R, HEAD_DIM), aw_ref[l, h],
                                preferred_element_type=jnp.float32)

        att = att + ab_ref[l]                               # output-proj bias
        att_out = _layernorm(att + x, alg_ref[l], alb_ref[l])   # residual + LN (dropout = id)

        # ---------------- FeedForward ----------------
        h1 = jnp.dot(att_out, f1w_ref[l], preferred_element_type=jnp.float32) + f1b_ref[l]
        h1 = _gelu_exact(h1)
        ffn = jnp.dot(h1, f2w_ref[l], preferred_element_type=jnp.float32) + f2b_ref[l]
        x = _layernorm(att_out + ffn, olg_ref[l], olb_ref[l])   # residual + LN (dropout = id)

        layer_out_ref[l] = x
        layer_ffn_ref[l] = ffn


# ------------------------------ wrapper ----------------------------------------
def _pallas_bert(emb2, mask_bias, params):
    R = BATCH * SEQ
    out_shapes = (
        jax.ShapeDtypeStruct((NUM_LAYERS, R, HIDDEN), jnp.float32),   # layer_outputs
        jax.ShapeDtypeStruct((NUM_LAYERS, R, HIDDEN), jnp.float32),   # layer_ffns
    )
    # No grid: every operand is a single whole-array VMEM block (total ~60 KB).
    return pl.pallas_call(_bert_kernel, out_shape=out_shapes)(
        emb2, mask_bias,
        params["emb_ln_g"], params["emb_ln_b"],
        params["wq"], params["wk"], params["wv"],
        params["attn_w"], params["attn_b"],
        params["attn_ln_g"], params["attn_ln_b"],
        params["ffn_w1"], params["ffn_b1"],
        params["ffn_w2"], params["ffn_b2"],
        params["out_ln_g"], params["out_ln_b"],
    )


def bert_forward(params, input_ids, attention_mask):
    B, S = input_ids.shape
    # Embedding gathers are glue (plain JAX); everything else is inside the Pallas kernel.
    # TODO(synk): the row gather itself has no clean tiny-shape Pallas equivalent; kept in XLA.
    word = jnp.take(params["word_emb"], input_ids, axis=0)            # (B, S, H)
    pos = params["pos_emb"][:S][None]                                 # (1, S, H)
    emb2 = (word + pos).reshape(B * S, HIDDEN).astype(jnp.float32)

    # Fully-broadcast additive attention bias (B, S, S): no broadcast inside the kernel loop.
    bias = jnp.where(attention_mask[:, None, :] == 0,
                     jnp.float32(NEG_BIAS), jnp.float32(0.0))         # (B, 1, S)
    mask_bias = jnp.broadcast_to(bias, (B, S, S))

    layer_out, layer_ffn = _pallas_bert(emb2, mask_bias, params)
    layer_out = layer_out.reshape(NUM_LAYERS, B, S, HIDDEN)
    layer_ffn = layer_ffn.reshape(NUM_LAYERS, B, S, HIDDEN)

    outputs = layer_out[NUM_LAYERS - 1]
    return (outputs,
            tuple(layer_out[i] for i in range(NUM_LAYERS)),
            tuple(layer_ffn[i] for i in range(NUM_LAYERS)))


# ------------------------------ parameters ------------------------------------
def init_params(key):
    def nrm(k, shape, scale=0.02):
        return scale * jax.random.normal(k, shape, dtype=jnp.float32)

    keys = iter(jax.random.split(key, 11))
    L, NH, H, D, I = NUM_LAYERS, NUM_HEADS, HIDDEN, HEAD_DIM, INTERMEDIATE

    params = {}
    word = nrm(next(keys), (VOCAB, H))
    params["word_emb"] = word.at[0].set(0.0)                 # padding_idx=0 row is zeros
    params["pos_emb"] = nrm(next(keys), (MAX_POS, H))
    params["emb_ln_g"] = jnp.ones((1, H), jnp.float32)
    params["emb_ln_b"] = jnp.zeros((1, H), jnp.float32)

    # Per-head QKV Linear(H, 3*D, bias=False) split into q/k/v and concatenated
    # head-wise on the output (lane) axis: (L, H, NH*D) = (L, H, H).
    params["wq"] = nrm(next(keys), (L, H, H))
    params["wk"] = nrm(next(keys), (L, H, H))
    params["wv"] = nrm(next(keys), (L, H, H))
    # Attention output projection (H, H) reorganized per head as (L, NH, D, H).
    params["attn_w"] = nrm(next(keys), (L, NH, D, H))
    params["attn_b"] = nrm(next(keys), (L, 1, H))
    params["attn_ln_g"] = jnp.ones((L, 1, H), jnp.float32)
    params["attn_ln_b"] = jnp.zeros((L, 1, H), jnp.float32)
    params["ffn_w1"] = nrm(next(keys), (L, H, I))
    params["ffn_b1"] = nrm(next(keys), (L, 1, I))
    params["ffn_w2"] = nrm(next(keys), (L, I, H))
    params["ffn_b2"] = nrm(next(keys), (L, 1, H))
    params["out_ln_g"] = jnp.ones((L, 1, H), jnp.float32)
    params["out_ln_b"] = jnp.zeros((L, 1, H), jnp.float32)
    return params


# ------------------------------ main --------------------------------------------
if __name__ == "__main__":
    key = jax.random.PRNGKey(0)
    kp, kids = jax.random.split(key)
    params = init_params(kp)

    input_ids = jax.random.randint(kids, (BATCH, SEQ), 1, VOCAB, dtype=jnp.int32)
    attention_mask = jnp.ones((BATCH, SEQ), dtype=jnp.int32)
    attention_mask = attention_mask.at[1, SEQ - 2:].set(0)   # exercise masking

    fwd = jax.jit(bert_forward)
    outputs, layer_outputs, layer_ffns = fwd(params, input_ids, attention_mask)
    jax.block_until_ready(outputs)
    jax.block_until_ready(layer_outputs)
    jax.block_until_ready(layer_ffns)

    assert outputs.shape == (BATCH, SEQ, HIDDEN)
    assert len(layer_outputs) == NUM_LAYERS and len(layer_ffns) == NUM_LAYERS
    assert all(o.shape == (BATCH, SEQ, HIDDEN) for o in layer_outputs)
    assert all(o.shape == (BATCH, SEQ, HIDDEN) for o in layer_ffns)
    assert bool(jnp.all(jnp.isfinite(outputs)))
    print("KERNEL_OK")
</pallas_src>

<mosaic_0001>
module attributes {stable_mosaic.version = 11 : i64} {
  func.func @_bert_kernel(%arg0: memref<16x32xf32, #tpu.memory_space<vmem>>, %arg1: memref<2x8x8xf32, #tpu.memory_space<vmem>>, %arg2: memref<1x32xf32, #tpu.memory_space<vmem>>, %arg3: memref<1x32xf32, #tpu.memory_space<vmem>>, %arg4: memref<2x32x32xf32, #tpu.memory_space<vmem>>, %arg5: memref<2x32x32xf32, #tpu.memory_space<vmem>>, %arg6: memref<2x32x32xf32, #tpu.memory_space<vmem>>, %arg7: memref<2x4x8x32xf32, #tpu.memory_space<vmem>>, %arg8: memref<2x1x32xf32, #tpu.memory_space<vmem>>, %arg9: memref<2x1x32xf32, #tpu.memory_space<vmem>>, %arg10: memref<2x1x32xf32, #tpu.memory_space<vmem>>, %arg11: memref<2x32x64xf32, #tpu.memory_space<vmem>>, %arg12: memref<2x1x64xf32, #tpu.memory_space<vmem>>, %arg13: memref<2x64x32xf32, #tpu.memory_space<vmem>>, %arg14: memref<2x1x32xf32, #tpu.memory_space<vmem>>, %arg15: memref<2x1x32xf32, #tpu.memory_space<vmem>>, %arg16: memref<2x1x32xf32, #tpu.memory_space<vmem>>, %arg17: memref<2x16x32xf32, #tpu.memory_space<vmem>>, %arg18: memref<2x16x32xf32, #tpu.memory_space<vmem>>) attributes {dimension_semantics = [], scalar_prefetch = 0 : i64, scratch_operands = 0 : i64, tpu.core_type = #tpu.core_type<tc>} {
    %c0 = arith.constant 0 : index
    %c0_0 = arith.constant 0 : index
    %c0_1 = arith.constant 0 : index
    %0 = vector.load %arg1[%c0, %c0_0, %c0_1] : memref<2x8x8xf32, #tpu.memory_space<vmem>>, vector<2x8x8xf32>
    %c0_2 = arith.constant 0 : index
    %c0_3 = arith.constant 0 : index
    %1 = vector.load %arg0[%c0_2, %c0_3] : memref<16x32xf32, #tpu.memory_space<vmem>>, vector<16x32xf32>
    %c0_4 = arith.constant 0 : index
    %c0_5 = arith.constant 0 : index
    %2 = vector.load %arg2[%c0_4, %c0_5] : memref<1x32xf32, #tpu.memory_space<vmem>>, vector<1x32xf32>
    %c0_6 = arith.constant 0 : index
    %c0_7 = arith.constant 0 : index
    %3 = vector.load %arg3[%c0_6, %c0_7] : memref<1x32xf32, #tpu.memory_space<vmem>>, vector<1x32xf32>
    %cst = arith.constant dense<0.000000e+00> : vector<16xf32>
    %4 = vector.multi_reduction <add>, %1, %cst [1] : vector<16x32xf32> to vector<16xf32>
    %5 = vector.shape_cast %4 : vector<16xf32> to vector<16x1xf32>
    %cst_8 = arith.constant 3.200000e+01 : f32
    %6 = vector.broadcast %cst_8 : f32 to vector<16x1xf32>
    %7 = arith.divf %5, %6 : vector<16x1xf32>
    %8 = vector.broadcast %7 : vector<16x1xf32> to vector<16x32xf32>
    %9 = arith.subf %1, %8 : vector<16x32xf32>
    %10 = arith.mulf %9, %9 : vector<16x32xf32>
    %cst_9 = arith.constant dense<0.000000e+00> : vector<16xf32>
    %11 = vector.multi_reduction <add>, %10, %cst_9 [1] : vector<16x32xf32> to vector<16xf32>
    %12 = vector.shape_cast %11 : vector<16xf32> to vector<16x1xf32>
    %cst_10 = arith.constant 3.200000e+01 : f32
    %13 = vector.broadcast %cst_10 : f32 to vector<16x1xf32>
    %14 = arith.divf %12, %13 : vector<16x1xf32>
    %cst_11 = arith.constant 9.99999996E-13 : f32
    %15 = vector.broadcast %cst_11 : f32 to vector<16x1xf32>
    %16 = arith.addf %14, %15 : vector<16x1xf32>
    %17 = math.rsqrt %16 : vector<16x1xf32>
    %18 = vector.broadcast %17 : vector<16x1xf32> to vector<16x32xf32>
    %19 = arith.mulf %9, %18 : vector<16x32xf32>
    %20 = vector.broadcast %2 : vector<1x32xf32> to vector<16x32xf32>
    %21 = arith.mulf %19, %20 : vector<16x32xf32>
    %22 = vector.broadcast %3 : vector<1x32xf32> to vector<16x32xf32>
    %23 = arith.addf %21, %22 : vector<16x32xf32>
    %c0_12 = arith.constant 0 : index
    %c0_13 = arith.constant 0 : index
    %c0_14 = arith.constant 0 : index
    %24 = vector.load %arg4[%c0_12, %c0_13, %c0_14] : memref<2x32x32xf32, #tpu.memory_space<vmem>>, vector<1x32x32xf32>
    %25 = vector.shape_cast %24 : vector<1x32x32xf32> to vector<32x32xf32>
    %cst_15 = arith.constant dense<0.000000e+00> : vector<16x32xf32>
    %26 = tpu.matmul %23, %25, %cst_15 {dimension_numbers = #tpu.dot_dimension_numbers<[1], [0], [0], [1], [0, 0, 1, 1], [], []>} : vector<16x32xf32>, vector<32x32xf32>, vector<16x32xf32> -> vector<16x32xf32>
    %cst_16 = arith.constant 0.176776692 : f32
    %27 = vector.broadcast %cst_16 : f32 to vector<16x32xf32>
    %28 = arith.mulf %26, %27 : vector<16x32xf32>
    %c0_17 = arith.constant 0 : index
    %c0_18 = arith.constant 0 : index
    %c0_19 = arith.constant 0 : index
    %29 = vector.load %arg5[%c0_17, %c0_18, %c0_19] : memref<2x32x32xf32, #tpu.memory_space<vmem>>, vector<1x32x32xf32>
    %30 = vector.shape_cast %29 : vector<1x32x32xf32> to vector<32x32xf32>
    %cst_20 = arith.constant dense<0.000000e+00> : vector<16x32xf32>
    %31 = tpu.matmul %23, %30, %cst_20 {dimension_numbers = #tpu.dot_dimension_numbers<[1], [0], [0], [1], [0, 0, 1, 1], [], []>} : vector<16x32xf32>, vector<32x32xf32>, vector<16x32xf32> -> vector<16x32xf32>
    %c0_21 = arith.constant 0 : index
    %c0_22 = arith.constant 0 : index
    %c0_23 = arith.constant 0 : index
    %32 = vector.load %arg6[%c0_21, %c0_22, %c0_23] : memref<2x32x32xf32, #tpu.memory_space<vmem>>, vector<1x32x32xf32>
    %33 = vector.shape_cast %32 : vector<1x32x32xf32> to vector<32x32xf32>
    %cst_24 = arith.constant dense<0.000000e+00> : vector<16x32xf32>
    %34 = tpu.matmul %23, %33, %cst_24 {dimension_numbers = #tpu.dot_dimension_numbers<[1], [0], [0], [1], [0, 0, 1, 1], [], []>} : vector<16x32xf32>, vector<32x32xf32>, vector<16x32xf32> -> vector<16x32xf32>
    %cst_25 = arith.constant 0.000000e+00 : f32
    %35 = vector.broadcast %cst_25 : f32 to vector<16x32xf32>
    %36 = vector.extract_strided_slice %28 {offsets = [0, 0], sizes = [16, 8], strides = [1, 1]} : vector<16x32xf32> to vector<16x8xf32>
    %37 = vector.shape_cast %36 : vector<16x8xf32> to vector<2x8x8xf32>
    %38 = vector.extract_strided_slice %31 {offsets = [0, 0], sizes = [16, 8], strides = [1, 1]} : vector<16x32xf32> to vector<16x8xf32>
    %39 = vector.shape_cast %38 : vector<16x8xf32> to vector<2x8x8xf32>
    %40 = vector.extract_strided_slice %34 {offsets = [0, 0], sizes = [16, 8], strides = [1, 1]} : vector<16x32xf32> to vector<16x8xf32>
    %41 = vector.shape_cast %40 : vector<16x8xf32> to vector<2x8x8xf32>
    "tpu.trace_start"() <{level = 10 : i32, message = "bqd,bkd->bqk"}> : () -> ()
    %cst_26 = arith.constant dense<0.000000e+00> : vector<2x8x8xf32>
    %42 = tpu.matmul %37, %39, %cst_26 {dimension_numbers = #tpu.dot_dimension_numbers<[2], [2], [1], [1], [0, 0, 0, 1, 1, 1], [0], [0]>} : vector<2x8x8xf32>, vector<2x8x8xf32>, vector<2x8x8xf32> -> vector<2x8x8xf32>
    "tpu.trace_stop"() : () -> ()
    %43 = arith.addf %42, %0 : vector<2x8x8xf32>
    %cst_27 = arith.constant dense<0xFF800000> : vector<2x8xf32>
    %44 = vector.multi_reduction <maximumf>, %43, %cst_27 [2] : vector<2x8x8xf32> to vector<2x8xf32>
    %45 = vector.shape_cast %44 : vector<2x8xf32> to vector<2x8x1xf32>
    %46 = vector.broadcast %45 : vector<2x8x1xf32> to vector<2x8x8xf32>
    %47 = arith.subf %43, %46 : vector<2x8x8xf32>
    %48 = math.exp %47 : vector<2x8x8xf32>
    %cst_28 = arith.constant dense<0.000000e+00> : vector<2x8xf32>
    %49 = vector.multi_reduction <add>, %48, %cst_28 [2] : vector<2x8x8xf32> to vector<2x8xf32>
    %50 = vector.shape_cast %49 : vector<2x8xf32> to vector<2x8x1xf32>
    %51 = tpu.reciprocal %50 {approx = true} : vector<2x8x1xf32> -> vector<2x8x1xf32>
    %52 = vector.broadcast %51 : vector<2x8x1xf32> to vector<2x8x8xf32>
    %53 = arith.mulf %48, %52 : vector<2x8x8xf32>
    "tpu.trace_start"() <{level = 10 : i32, message = "bqk,bkd->bqd"}> : () -> ()
    %cst_29 = arith.constant dense<0.000000e+00> : vector<2x8x8xf32>
    %54 = tpu.matmul %53, %41, %cst_29 {dimension_numbers = #tpu.dot_dimension_numbers<[2], [1], [1], [2], [0, 0, 0, 1, 1, 2], [0], [0]>} : vector<2x8x8xf32>, vector<2x8x8xf32>, vector<2x8x8xf32> -> vector<2x8x8xf32>
    "tpu.trace_stop"() : () -> ()
    %55 = vector.shape_cast %54 : vector<2x8x8xf32> to vector<16x8xf32>
    %c0_30 = arith.constant 0 : index
    %c0_31 = arith.constant 0 : index
    %c0_32 = arith.constant 0 : index
    %c0_33 = arith.constant 0 : index
    %56 = vector.load %arg7[%c0_30, %c0_31, %c0_32, %c0_33] : memref<2x4x8x32xf32, #tpu.memory_space<vmem>>, vector<1x1x8x32xf32>
    %57 = vector.shape_cast %56 : vector<1x1x8x32xf32> to vector<8x32xf32>
    %cst_34 = arith.constant dense<0.000000e+00> : vector<16x32xf32>
    %58 = tpu.matmul %55, %57, %cst_34 {dimension_numbers = #tpu.dot_dimension_numbers<[1], [0], [0], [1], [0, 0, 1, 1], [], []>} : vector<16x8xf32>, vector<8x32xf32>, vector<16x32xf32> -> vector<16x32xf32>
    %59 = arith.addf %35, %58 : vector<16x32xf32>
    %60 = vector.extract_strided_slice %28 {offsets = [0, 8], sizes = [16, 8], strides = [1, 1]} : vector<16x32xf32> to vector<16x8xf32>
    %61 = vector.shape_cast %60 : vector<16x8xf32> to vector<2x8x8xf32>
    %62 = vector.extract_strided_slice %31 {offsets = [0, 8], sizes = [16, 8], strides = [1, 1]} : vector<16x32xf32> to vector<16x8xf32>
    %63 = vector.shape_cast %62 : vector<16x8xf32> to vector<2x8x8xf32>
    %64 = vector.extract_strided_slice %34 {offsets = [0, 8], sizes = [16, 8], strides = [1, 1]} : vector<16x32xf32> to vector<16x8xf32>
    %65 = vector.shape_cast %64 : vector<16x8xf32> to vector<2x8x8xf32>
    "tpu.trace_start"() <{level = 10 : i32, message = "bqd,bkd->bqk"}> : () -> ()
    %cst_35 = arith.constant dense<0.000000e+00> : vector<2x8x8xf32>
    %66 = tpu.matmul %61, %63, %cst_35 {dimension_numbers = #tpu.dot_dimension_numbers<[2], [2], [1], [1], [0, 0, 0, 1, 1, 1], [0], [0]>} : vector<2x8x8xf32>, vector<2x8x8xf32>, vector<2x8x8xf32> -> vector<2x8x8xf32>
    "tpu.trace_stop"() : () -> ()
    %67 = arith.addf %66, %0 : vector<2x8x8xf32>
    %cst_36 = arith.constant dense<0xFF800000> : vector<2x8xf32>
    %68 = vector.multi_reduction <maximumf>, %67, %cst_36 [2] : vector<2x8x8xf32> to vector<2x8xf32>
    %69 = vector.shape_cast %68 : vector<2x8xf32> to vector<2x8x1xf32>
    %70 = vector.broadcast %69 : vector<2x8x1xf32> to vector<2x8x8xf32>
    %71 = arith.subf %67, %70 : vector<2x8x8xf32>
    %72 = math.exp %71 : vector<2x8x8xf32>
    %cst_37 = arith.constant dense<0.000000e+00> : vector<2x8xf32>
    %73 = vector.multi_reduction <add>, %72, %cst_37 [2] : vector<2x8x8xf32> to vector<2x8xf32>
    %74 = vector.shape_cast %73 : vector<2x8xf32> to vector<2x8x1xf32>
    %75 = tpu.reciprocal %74 {approx = true} : vector<2x8x1xf32> -> vector<2x8x1xf32>
    %76 = vector.broadcast %75 : vector<2x8x1xf32> to vector<2x8x8xf32>
    %77 = arith.mulf %72, %76 : vector<2x8x8xf32>
    "tpu.trace_start"() <{level = 10 : i32, message = "bqk,bkd->bqd"}> : () -> ()
    %cst_38 = arith.constant dense<0.000000e+00> : vector<2x8x8xf32>
    %78 = tpu.matmul %77, %65, %cst_38 {dimension_numbers = #tpu.dot_dimension_numbers<[2], [1], [1], [2], [0, 0, 0, 1, 1, 2], [0], [0]>} : vector<2x8x8xf32>, vector<2x8x8xf32>, vector<2x8x8xf32> -> vector<2x8x8xf32>
    "tpu.trace_stop"() : () -> ()
    %79 = vector.shape_cast %78 : vector<2x8x8xf32> to vector<16x8xf32>
    %c0_39 = arith.constant 0 : index
    %c1 = arith.constant 1 : index
    %c0_40 = arith.constant 0 : index
    %c0_41 = arith.constant 0 : index
    %80 = vector.load %arg7[%c0_39, %c1, %c0_40, %c0_41] : memref<2x4x8x32xf32, #tpu.memory_space<vmem>>, vector<1x1x8x32xf32>
    %81 = vector.shape_cast %80 : vector<1x1x8x32xf32> to vector<8x32xf32>
    %cst_42 = arith.constant dense<0.000000e+00> : vector<16x32xf32>
    %82 = tpu.matmul %79, %81, %cst_42 {dimension_numbers = #tpu.dot_dimension_numbers<[1], [0], [0], [1], [0, 0, 1, 1], [], []>} : vector<16x8xf32>, vector<8x32xf32>, vector<16x32xf32> -> vector<16x32xf32>
    %83 = arith.addf %59, %82 : vector<16x32xf32>
    %84 = vector.extract_strided_slice %28 {offsets = [0, 16], sizes = [16, 8], strides = [1, 1]} : vector<16x32xf32> to vector<16x8xf32>
    %85 = vector.shape_cast %84 : vector<16x8xf32> to vector<2x8x8xf32>
    %86 = vector.extract_strided_slice %31 {offsets = [0, 16], sizes = [16, 8], strides = [1, 1]} : vector<16x32xf32> to vector<16x8xf32>
    %87 = vector.shape_cast %86 : vector<16x8xf32> to vector<2x8x8xf32>
    %88 = vector.extract_strided_slice %34 {offsets = [0, 16], sizes = [16, 8], strides = [1, 1]} : vector<16x32xf32> to vector<16x8xf32>
    %89 = vector.shape_cast %88 : vector<16x8xf32> to vector<2x8x8xf32>
    "tpu.trace_start"() <{level = 10 : i32, message = "bqd,bkd->bqk"}> : () -> ()
    %cst_43 = arith.constant dense<0.000000e+00> : vector<2x8x8xf32>
    %90 = tpu.matmul %85, %87, %cst_43 {dimension_numbers = #tpu.dot_dimension_numbers<[2], [2], [1], [1], [0, 0, 0, 1, 1, 1], [0], [0]>} : vector<2x8x8xf32>, vector<2x8x8xf32>, vector<2x8x8xf32> -> vector<2x8x8xf32>
    "tpu.trace_stop"() : () -> ()
    %91 = arith.addf %90, %0 : vector<2x8x8xf32>
    %cst_44 = arith.constant dense<0xFF800000> : vector<2x8xf32>
    %92 = vector.multi_reduction <maximumf>, %91, %cst_44 [2] : vector<2x8x8xf32> to vector<2x8xf32>
    %93 = vector.shape_cast %92 : vector<2x8xf32> to vector<2x8x1xf32>
    %94 = vector.broadcast %93 : vector<2x8x1xf32> to vector<2x8x8xf32>
    %95 = arith.subf %91, %94 : vector<2x8x8xf32>
    %96 = math.exp %95 : vector<2x8x8xf32>
    %cst_45 = arith.constant dense<0.000000e+00> : vector<2x8xf32>
    %97 = vector.multi_reduction <add>, %96, %cst_45 [2] : vector<2x8x8xf32> to vector<2x8xf32>
    %98 = vector.shape_cast %97 : vector<2x8xf32> to vector<2x8x1xf32>
    %99 = tpu.reciprocal %98 {approx = true} : vector<2x8x1xf32> -> vector<2x8x1xf32>
    %100 = vector.broadcast %99 : vector<2x8x1xf32> to vector<2x8x8xf32>
    %101 = arith.mulf %96, %100 : vector<2x8x8xf32>
    "tpu.trace_start"() <{level = 10 : i32, message = "bqk,bkd->bqd"}> : () -> ()
    %cst_46 = arith.constant dense<0.000000e+00> : vector<2x8x8xf32>
    %102 = tpu.matmul %101, %89, %cst_46 {dimension_numbers = #tpu.dot_dimension_numbers<[2], [1], [1], [2], [0, 0, 0, 1, 1, 2], [0], [0]>} : vector<2x8x8xf32>, vector<2x8x8xf32>, vector<2x8x8xf32> -> vector<2x8x8xf32>
    "tpu.trace_stop"() : () -> ()
    %103 = vector.shape_cast %102 : vector<2x8x8xf32> to vector<16x8xf32>
    %c0_47 = arith.constant 0 : index
    %c2 = arith.constant 2 : index
    %c0_48 = arith.constant 0 : index
    %c0_49 = arith.constant 0 : index
    %104 = vector.load %arg7[%c0_47, %c2, %c0_48, %c0_49] : memref<2x4x8x32xf32, #tpu.memory_space<vmem>>, vector<1x1x8x32xf32>
    %105 = vector.shape_cast %104 : vector<1x1x8x32xf32> to vector<8x32xf32>
    %cst_50 = arith.constant dense<0.000000e+00> : vector<16x32xf32>
    %106 = tpu.matmul %103, %105, %cst_50 {dimension_numbers = #tpu.dot_dimension_numbers<[1], [0], [0], [1], [0, 0, 1, 1], [], []>} : vector<16x8xf32>, vector<8x32xf32>, vector<16x32xf32> -> vector<16x32xf32>
    %107 = arith.addf %83, %106 : vector<16x32xf32>
    %108 = vector.extract_strided_slice %28 {offsets = [0, 24], sizes = [16, 8], strides = [1, 1]} : vector<16x32xf32> to vector<16x8xf32>
    %109 = vector.shape_cast %108 : vector<16x8xf32> to vector<2x8x8xf32>
    %110 = vector.extract_strided_slice %31 {offsets = [0, 24], sizes = [16, 8], strides = [1, 1]} : vector<16x32xf32> to vector<16x8xf32>
    %111 = vector.shape_cast %110 : vector<16x8xf32> to vector<2x8x8xf32>
    %112 = vector.extract_strided_slice %34 {offsets = [0, 24], sizes = [16, 8], strides = [1, 1]} : vector<16x32xf32> to vector<16x8xf32>
    %113 = vector.shape_cast %112 : vector<16x8xf32> to vector<2x8x8xf32>
    "tpu.trace_start"() <{level = 10 : i32, message = "bqd,bkd->bqk"}> : () -> ()
    %cst_51 = arith.constant dense<0.000000e+00> : vector<2x8x8xf32>
    %114 = tpu.matmul %109, %111, %cst_51 {dimension_numbers = #tpu.dot_dimension_numbers<[2], [2], [1], [1], [0, 0, 0, 1, 1, 1], [0], [0]>} : vector<2x8x8xf32>, vector<2x8x8xf32>, vector<2x8x8xf32> -> vector<2x8x8xf32>
    "tpu.trace_stop"() : () -> ()
    %115 = arith.addf %114, %0 : vector<2x8x8xf32>
    %cst_52 = arith.constant dense<0xFF800000> : vector<2x8xf32>
    %116 = vector.multi_reduction <maximumf>, %115, %cst_52 [2] : vector<2x8x8xf32> to vector<2x8xf32>
    %117 = vector.shape_cast %116 : vector<2x8xf32> to vector<2x8x1xf32>
    %118 = vector.broadcast %117 : vector<2x8x1xf32> to vector<2x8x8xf32>
    %119 = arith.subf %115, %118 : vector<2x8x8xf32>
    %120 = math.exp %119 : vector<2x8x8xf32>
    %cst_53 = arith.constant dense<0.000000e+00> : vector<2x8xf32>
    %121 = vector.multi_reduction <add>, %120, %cst_53 [2] : vector<2x8x8xf32> to vector<2x8xf32>
    %122 = vector.shape_cast %121 : vector<2x8xf32> to vector<2x8x1xf32>
    %123 = tpu.reciprocal %122 {approx = true} : vector<2x8x1xf32> -> vector<2x8x1xf32>
    %124 = vector.broadcast %123 : vector<2x8x1xf32> to vector<2x8x8xf32>
    %125 = arith.mulf %120, %124 : vector<2x8x8xf32>
    "tpu.trace_start"() <{level = 10 : i32, message = "bqk,bkd->bqd"}> : () -> ()
    %cst_54 = arith.constant dense<0.000000e+00> : vector<2x8x8xf32>
    %126 = tpu.matmul %125, %113, %cst_54 {dimension_numbers = #tpu.dot_dimension_numbers<[2], [1], [1], [2], [0, 0, 0, 1, 1, 2], [0], [0]>} : vector<2x8x8xf32>, vector<2x8x8xf32>, vector<2x8x8xf32> -> vector<2x8x8xf32>
    "tpu.trace_stop"() : () -> ()
    %127 = vector.shape_cast %126 : vector<2x8x8xf32> to vector<16x8xf32>
    %c0_55 = arith.constant 0 : index
    %c3 = arith.constant 3 : index
    %c0_56 = arith.constant 0 : index
    %c0_57 = arith.constant 0 : index
    %128 = vector.load %arg7[%c0_55, %c3, %c0_56, %c0_57] : memref<2x4x8x32xf32, #tpu.memory_space<vmem>>, vector<1x1x8x32xf32>
    %129 = vector.shape_cast %128 : vector<1x1x8x32xf32> to vector<8x32xf32>
    %cst_58 = arith.constant dense<0.000000e+00> : vector<16x32xf32>
    %130 = tpu.matmul %127, %129, %cst_58 {dimension_numbers = #tpu.dot_dimension_numbers<[1], [0], [0], [1], [0, 0, 1, 1], [], []>} : vector<16x8xf32>, vector<8x32xf32>, vector<16x32xf32> -> vector<16x32xf32>
    %131 = arith.addf %107, %130 : vector<16x32xf32>
    %c0_59 = arith.constant 0 : index
    %c0_60 = arith.constant 0 : index
    %c0_61 = arith.constant 0 : index
    %132 = vector.load %arg8[%c0_59, %c0_60, %c0_61] : memref<2x1x32xf32, #tpu.memory_space<vmem>>, vector<1x1x32xf32>
    %133 = vector.shape_cast %132 : vector<1x1x32xf32> to vector<1x32xf32>
    %134 = vector.broadcast %133 : vector<1x32xf32> to vector<16x32xf32>
    %135 = arith.addf %131, %134 : vector<16x32xf32>
    %136 = arith.addf %135, %23 : vector<16x32xf32>
    %c0_62 = arith.constant 0 : index
    %c0_63 = arith.constant 0 : index
    %c0_64 = arith.constant 0 : index
    %137 = vector.load %arg9[%c0_62, %c0_63, %c0_64] : memref<2x1x32xf32, #tpu.memory_space<vmem>>, vector<1x1x32xf32>
    %138 = vector.shape_cast %137 : vector<1x1x32xf32> to vector<1x32xf32>
    %c0_65 = arith.constant 0 : index
    %c0_66 = arith.constant 0 : index
    %c0_67 = arith.constant 0 : index
    %139 = vector.load %arg10[%c0_65, %c0_66, %c0_67] : memref<2x1x32xf32, #tpu.memory_space<vmem>>, vector<1x1x32xf32>
    %140 = vector.shape_cast %139 : vector<1x1x32xf32> to vector<1x32xf32>
    %cst_68 = arith.constant dense<0.000000e+00> : vector<16xf32>
    %141 = vector.multi_reduction <add>, %136, %cst_68 [1] : vector<16x32xf32> to vector<16xf32>
    %142 = vector.shape_cast %141 : vector<16xf32> to vector<16x1xf32>
    %cst_69 = arith.constant 3.200000e+01 : f32
    %143 = vector.broadcast %cst_69 : f32 to vector<16x1xf32>
    %144 = arith.divf %142, %143 : vector<16x1xf32>
    %145 = vector.broadcast %144 : vector<16x1xf32> to vector<16x32xf32>
    %146 = arith.subf %136, %145 : vector<16x32xf32>
    %147 = arith.mulf %146, %146 : vector<16x32xf32>
    %cst_70 = arith.constant dense<0.000000e+00> : vector<16xf32>
    %148 = vector.multi_reduction <add>, %147, %cst_70 [1] : vector<16x32xf32> to vector<16xf32>
    %149 = vector.shape_cast %148 : vector<16xf32> to vector<16x1xf32>
    %cst_71 = arith.constant 3.200000e+01 : f32
    %150 = vector.broadcast %cst_71 : f32 to vector<16x1xf32>
    %151 = arith.divf %149, %150 : vector<16x1xf32>
    %cst_72 = arith.constant 9.99999996E-13 : f32
    %152 = vector.broadcast %cst_72 : f32 to vector<16x1xf32>
    %153 = arith.addf %151, %152 : vector<16x1xf32>
    %154 = math.rsqrt %153 : vector<16x1xf32>
    %155 = vector.broadcast %154 : vector<16x1xf32> to vector<16x32xf32>
    %156 = arith.mulf %146, %155 : vector<16x32xf32>
    %157 = vector.broadcast %138 : vector<1x32xf32> to vector<16x32xf32>
    %158 = arith.mulf %156, %157 : vector<16x32xf32>
    %159 = vector.broadcast %140 : vector<1x32xf32> to vector<16x32xf32>
    %160 = arith.addf %158, %159 : vector<16x32xf32>
    %c0_73 = arith.constant 0 : index
    %c0_74 = arith.constant 0 : index
    %c0_75 = arith.constant 0 : index
    %161 = vector.load %arg11[%c0_73, %c0_74, %c0_75] : memref<2x32x64xf32, #tpu.memory_space<vmem>>, vector<1x32x64xf32>
    %162 = vector.shape_cast %161 : vector<1x32x64xf32> to vector<32x64xf32>
    %cst_76 = arith.constant dense<0.000000e+00> : vector<16x64xf32>
    %163 = tpu.matmul %160, %162, %cst_76 {dimension_numbers = #tpu.dot_dimension_numbers<[1], [0], [0], [1], [0, 0, 1, 1], [], []>} : vector<16x32xf32>, vector<32x64xf32>, vector<16x64xf32> -> vector<16x64xf32>
    %c0_77 = arith.constant 0 : index
    %c0_78 = arith.constant 0 : index
    %c0_79 = arith.constant 0 : index
    %164 = vector.load %arg12[%c0_77, %c0_78, %c0_79] : memref<2x1x64xf32, #tpu.memory_space<vmem>>, vector<1x1x64xf32>
    %165 = vector.shape_cast %164 : vector<1x1x64xf32> to vector<1x64xf32>
    %166 = vector.broadcast %165 : vector<1x64xf32> to vector<16x64xf32>
    %167 = arith.addf %163, %166 : vector<16x64xf32>
    %cst_80 = arith.constant 5.000000e-01 : f32
    %168 = vector.broadcast %cst_80 : f32 to vector<16x64xf32>
    %169 = arith.mulf %168, %167 : vector<16x64xf32>
    %cst_81 = arith.constant 0.707106769 : f32
    %170 = vector.broadcast %cst_81 : f32 to vector<16x64xf32>
    %171 = arith.mulf %167, %170 : vector<16x64xf32>
    %172 = math.erf %171 : vector<16x64xf32>
    %cst_82 = arith.constant 1.000000e+00 : f32
    %173 = vector.broadcast %cst_82 : f32 to vector<16x64xf32>
    %174 = arith.addf %173, %172 : vector<16x64xf32>
    %175 = arith.mulf %169, %174 : vector<16x64xf32>
    %c0_83 = arith.constant 0 : index
    %c0_84 = arith.constant 0 : index
    %c0_85 = arith.constant 0 : index
    %176 = vector.load %arg13[%c0_83, %c0_84, %c0_85] : memref<2x64x32xf32, #tpu.memory_space<vmem>>, vector<1x64x32xf32>
    %177 = vector.shape_cast %176 : vector<1x64x32xf32> to vector<64x32xf32>
    %cst_86 = arith.constant dense<0.000000e+00> : vector<16x32xf32>
    %178 = tpu.matmul %175, %177, %cst_86 {dimension_numbers = #tpu.dot_dimension_numbers<[1], [0], [0], [1], [0, 0, 1, 1], [], []>} : vector<16x64xf32>, vector<64x32xf32>, vector<16x32xf32> -> vector<16x32xf32>
    %c0_87 = arith.constant 0 : index
    %c0_88 = arith.constant 0 : index
    %c0_89 = arith.constant 0 : index
    %179 = vector.load %arg14[%c0_87, %c0_88, %c0_89] : memref<2x1x32xf32, #tpu.memory_space<vmem>>, vector<1x1x32xf32>
    %180 = vector.shape_cast %179 : vector<1x1x32xf32> to vector<1x32xf32>
    %181 = vector.broadcast %180 : vector<1x32xf32> to vector<16x32xf32>
    %182 = arith.addf %178, %181 : vector<16x32xf32>
    %183 = arith.addf %160, %182 : vector<16x32xf32>
    %c0_90 = arith.constant 0 : index
    %c0_91 = arith.constant 0 : index
    %c0_92 = arith.constant 0 : index
    %184 = vector.load %arg15[%c0_90, %c0_91, %c0_92] : memref<2x1x32xf32, #tpu.memory_space<vmem>>, vector<1x1x32xf32>
    %185 = vector.shape_cast %184 : vector<1x1x32xf32> to vector<1x32xf32>
    %c0_93 = arith.constant 0 : index
    %c0_94 = arith.constant 0 : index
    %c0_95 = arith.constant 0 : index
    %186 = vector.load %arg16[%c0_93, %c0_94, %c0_95] : memref<2x1x32xf32, #tpu.memory_space<vmem>>, vector<1x1x32xf32>
    %187 = vector.shape_cast %186 : vector<1x1x32xf32> to vector<1x32xf32>
    %cst_96 = arith.constant dense<0.000000e+00> : vector<16xf32>
    %188 = vector.multi_reduction <add>, %183, %cst_96 [1] : vector<16x32xf32> to vector<16xf32>
    %189 = vector.shape_cast %188 : vector<16xf32> to vector<16x1xf32>
    %cst_97 = arith.constant 3.200000e+01 : f32
    %190 = vector.broadcast %cst_97 : f32 to vector<16x1xf32>
    %191 = arith.divf %189, %190 : vector<16x1xf32>
    %192 = vector.broadcast %191 : vector<16x1xf32> to vector<16x32xf32>
    %193 = arith.subf %183, %192 : vector<16x32xf32>
    %194 = arith.mulf %193, %193 : vector<16x32xf32>
    %cst_98 = arith.constant dense<0.000000e+00> : vector<16xf32>
    %195 = vector.multi_reduction <add>, %194, %cst_98 [1] : vector<16x32xf32> to vector<16xf32>
    %196 = vector.shape_cast %195 : vector<16xf32> to vector<16x1xf32>
    %cst_99 = arith.constant 3.200000e+01 : f32
    %197 = vector.broadcast %cst_99 : f32 to vector<16x1xf32>
    %198 = arith.divf %196, %197 : vector<16x1xf32>
    %cst_100 = arith.constant 9.99999996E-13 : f32
    %199 = vector.broadcast %cst_100 : f32 to vector<16x1xf32>
    %200 = arith.addf %198, %199 : vector<16x1xf32>
    %201 = math.rsqrt %200 : vector<16x1xf32>
    %202 = vector.broadcast %201 : vector<16x1xf32> to vector<16x32xf32>
    %203 = arith.mulf %193, %202 : vector<16x32xf32>
    %204 = vector.broadcast %185 : vector<1x32xf32> to vector<16x32xf32>
    %205 = arith.mulf %203, %204 : vector<16x32xf32>
    %206 = vector.broadcast %187 : vector<1x32xf32> to vector<16x32xf32>
    %207 = arith.addf %205, %206 : vector<16x32xf32>
    %c0_101 = arith.constant 0 : index
    %c0_102 = arith.constant 0 : index
    %c0_103 = arith.constant 0 : index
    %208 = vector.load %arg17[%c0_101, %c0_102, %c0_103] : memref<2x16x32xf32, #tpu.memory_space<vmem>>, vector<1x16x32xf32>
    %209 = vector.shape_cast %208 : vector<1x16x32xf32> to vector<16x32xf32>
    %210 = vector.shape_cast %207 : vector<16x32xf32> to vector<1x16x32xf32>
    tpu.vector_store %arg17[%c0_101, %c0_102, %c0_103], %210 {strides = array<i32>} : memref<2x16x32xf32, #tpu.memory_space<vmem>>, vector<1x16x32xf32>,
    %c0_104 = arith.constant 0 : index
    %c0_105 = arith.constant 0 : index
    %c0_106 = arith.constant 0 : index
    %211 = vector.load %arg18[%c0_104, %c0_105, %c0_106] : memref<2x16x32xf32, #tpu.memory_space<vmem>>, vector<1x16x32xf32>
    %212 = vector.shape_cast %211 : vector<1x16x32xf32> to vector<16x32xf32>
    %213 = vector.shape_cast %182 : vector<16x32xf32> to vector<1x16x32xf32>
    tpu.vector_store %arg18[%c0_104, %c0_105, %c0_106], %213 {strides = array<i32>} : memref<2x16x32xf32, #tpu.memory_space<vmem>>, vector<1x16x32xf32>,
    %c1_107 = arith.constant 1 : index
    %c0_108 = arith.constant 0 : index
    %c0_109 = arith.constant 0 : index
    %214 = vector.load %arg4[%c1_107, %c0_108, %c0_109] : memref<2x32x32xf32, #tpu.memory_space<vmem>>, vector<1x32x32xf32>
    %215 = vector.shape_cast %214 : vector<1x32x32xf32> to vector<32x32xf32>
    %cst_110 = arith.constant dense<0.000000e+00> : vector<16x32xf32>
    %216 = tpu.matmul %207, %215, %cst_110 {dimension_numbers = #tpu.dot_dimension_numbers<[1], [0], [0], [1], [0, 0, 1, 1], [], []>} : vector<16x32xf32>, vector<32x32xf32>, vector<16x32xf32> -> vector<16x32xf32>
    %cst_111 = arith.constant 0.176776692 : f32
    %217 = vector.broadcast %cst_111 : f32 to vector<16x32xf32>
    %218 = arith.mulf %216, %217 : vector<16x32xf32>
    %c1_112 = arith.constant 1 : index
    %c0_113 = arith.constant 0 : index
    %c0_114 = arith.constant 0 : index
    %219 = vector.load %arg5[%c1_112, %c0_113, %c0_114] : memref<2x32x32xf32, #tpu.memory_space<vmem>>, vector<1x32x32xf32>
    %220 = vector.shape_cast %219 : vector<1x32x32xf32> to vector<32x32xf32>
    %cst_115 = arith.constant dense<0.000000e+00> : vector<16x32xf32>
    %221 = tpu.matmul %207, %220, %cst_115 {dimension_numbers = #tpu.dot_dimension_numbers<[1], [0], [0], [1], [0, 0, 1, 1], [], []>} : vector<16x32xf32>, vector<32x32xf32>, vector<16x32xf32> -> vector<16x32xf32>
    %c1_116 = arith.constant 1 : index
    %c0_117 = arith.constant 0 : index
    %c0_118 = arith.constant 0 : index
    %222 = vector.load %arg6[%c1_116, %c0_117, %c0_118] : memref<2x32x32xf32, #tpu.memory_space<vmem>>, vector<1x32x32xf32>
    %223 = vector.shape_cast %222 : vector<1x32x32xf32> to vector<32x32xf32>
    %cst_119 = arith.constant dense<0.000000e+00> : vector<16x32xf32>
    %224 = tpu.matmul %207, %223, %cst_119 {dimension_numbers = #tpu.dot_dimension_numbers<[1], [0], [0], [1], [0, 0, 1, 1], [], []>} : vector<16x32xf32>, vector<32x32xf32>, vector<16x32xf32> -> vector<16x32xf32>
    %cst_120 = arith.constant 0.000000e+00 : f32
    %225 = vector.broadcast %cst_120 : f32 to vector<16x32xf32>
    %226 = vector.extract_strided_slice %218 {offsets = [0, 0], sizes = [16, 8], strides = [1, 1]} : vector<16x32xf32> to vector<16x8xf32>
    %227 = vector.shape_cast %226 : vector<16x8xf32> to vector<2x8x8xf32>
    %228 = vector.extract_strided_slice %221 {offsets = [0, 0], sizes = [16, 8], strides = [1, 1]} : vector<16x32xf32> to vector<16x8xf32>
    %229 = vector.shape_cast %228 : vector<16x8xf32> to vector<2x8x8xf32>
    %230 = vector.extract_strided_slice %224 {offsets = [0, 0], sizes = [16, 8], strides = [1, 1]} : vector<16x32xf32> to vector<16x8xf32>
    %231 = vector.shape_cast %230 : vector<16x8xf32> to vector<2x8x8xf32>
    "tpu.trace_start"() <{level = 10 : i32, message = "bqd,bkd->bqk"}> : () -> ()
    %cst_121 = arith.constant dense<0.000000e+00> : vector<2x8x8xf32>
    %232 = tpu.matmul %227, %229, %cst_121 {dimension_numbers = #tpu.dot_dimension_numbers<[2], [2], [1], [1], [0, 0, 0, 1, 1, 1], [0], [0]>} : vector<2x8x8xf32>, vector<2x8x8xf32>, vector<2x8x8xf32> -> vector<2x8x8xf32>
    "tpu.trace_stop"() : () -> ()
    %233 = arith.addf %232, %0 : vector<2x8x8xf32>
    %cst_122 = arith.constant dense<0xFF800000> : vector<2x8xf32>
    %234 = vector.multi_reduction <maximumf>, %233, %cst_122 [2] : vector<2x8x8xf32> to vector<2x8xf32>
    %235 = vector.shape_cast %234 : vector<2x8xf32> to vector<2x8x1xf32>
    %236 = vector.broadcast %235 : vector<2x8x1xf32> to vector<2x8x8xf32>
    %237 = arith.subf %233, %236 : vector<2x8x8xf32>
    %238 = math.exp %237 : vector<2x8x8xf32>
    %cst_123 = arith.constant dense<0.000000e+00> : vector<2x8xf32>
    %239 = vector.multi_reduction <add>, %238, %cst_123 [2] : vector<2x8x8xf32> to vector<2x8xf32>
    %240 = vector.shape_cast %239 : vector<2x8xf32> to vector<2x8x1xf32>
    %241 = tpu.reciprocal %240 {approx = true} : vector<2x8x1xf32> -> vector<2x8x1xf32>
    %242 = vector.broadcast %241 : vector<2x8x1xf32> to vector<2x8x8xf32>
    %243 = arith.mulf %238, %242 : vector<2x8x8xf32>
    "tpu.trace_start"() <{level = 10 : i32, message = "bqk,bkd->bqd"}> : () -> ()
    %cst_124 = arith.constant dense<0.000000e+00> : vector<2x8x8xf32>
    %244 = tpu.matmul %243, %231, %cst_124 {dimension_numbers = #tpu.dot_dimension_numbers<[2], [1], [1], [2], [0, 0, 0, 1, 1, 2], [0], [0]>} : vector<2x8x8xf32>, vector<2x8x8xf32>, vector<2x8x8xf32> -> vector<2x8x8xf32>
    "tpu.trace_stop"() : () -> ()
    %245 = vector.shape_cast %244 : vector<2x8x8xf32> to vector<16x8xf32>
    %c1_125 = arith.constant 1 : index
    %c0_126 = arith.constant 0 : index
    %c0_127 = arith.constant 0 : index
    %c0_128 = arith.constant 0 : index
    %246 = vector.load %arg7[%c1_125, %c0_126, %c0_127, %c0_128] : memref<2x4x8x32xf32, #tpu.memory_space<vmem>>, vector<1x1x8x32xf32>
    %247 = vector.shape_cast %246 : vector<1x1x8x32xf32> to vector<8x32xf32>
    %cst_129 = arith.constant dense<0.000000e+00> : vector<16x32xf32>
    %248 = tpu.matmul %245, %247, %cst_129 {dimension_numbers = #tpu.dot_dimension_numbers<[1], [0], [0], [1], [0, 0, 1, 1], [], []>} : vector<16x8xf32>, vector<8x32xf32>, vector<16x32xf32> -> vector<16x32xf32>
    %249 = arith.addf %225, %248 : vector<16x32xf32>
    %250 = vector.extract_strided_slice %218 {offsets = [0, 8], sizes = [16, 8], strides = [1, 1]} : vector<16x32xf32> to vector<16x8xf32>
    %251 = vector.shape_cast %250 : vector<16x8xf32> to vector<2x8x8xf32>
    %252 = vector.extract_strided_slice %221 {offsets = [0, 8], sizes = [16, 8], strides = [1, 1]} : vector<16x32xf32> to vector<16x8xf32>
    %253 = vector.shape_cast %252 : vector<16x8xf32> to vector<2x8x8xf32>
    %254 = vector.extract_strided_slice %224 {offsets = [0, 8], sizes = [16, 8], strides = [1, 1]} : vector<16x32xf32> to vector<16x8xf32>
    %255 = vector.shape_cast %254 : vector<16x8xf32> to vector<2x8x8xf32>
    "tpu.trace_start"() <{level = 10 : i32, message = "bqd,bkd->bqk"}> : () -> ()
    %cst_130 = arith.constant dense<0.000000e+00> : vector<2x8x8xf32>
    %256 = tpu.matmul %251, %253, %cst_130 {dimension_numbers = #tpu.dot_dimension_numbers<[2], [2], [1], [1], [0, 0, 0, 1, 1, 1], [0], [0]>} : vector<2x8x8xf32>, vector<2x8x8xf32>, vector<2x8x8xf32> -> vector<2x8x8xf32>
    "tpu.trace_stop"() : () -> ()
    %257 = arith.addf %256, %0 : vector<2x8x8xf32>
    %cst_131 = arith.constant dense<0xFF800000> : vector<2x8xf32>
    %258 = vector.multi_reduction <maximumf>, %257, %cst_131 [2] : vector<2x8x8xf32> to vector<2x8xf32>
    %259 = vector.shape_cast %258 : vector<2x8xf32> to vector<2x8x1xf32>
    %260 = vector.broadcast %259 : vector<2x8x1xf32> to vector<2x8x8xf32>
    %261 = arith.subf %257, %260 : vector<2x8x8xf32>
    %262 = math.exp %261 : vector<2x8x8xf32>
    %cst_132 = arith.constant dense<0.000000e+00> : vector<2x8xf32>
    %263 = vector.multi_reduction <add>, %262, %cst_132 [2] : vector<2x8x8xf32> to vector<2x8xf32>
    %264 = vector.shape_cast %263 : vector<2x8xf32> to vector<2x8x1xf32>
    %265 = tpu.reciprocal %264 {approx = true} : vector<2x8x1xf32> -> vector<2x8x1xf32>
    %266 = vector.broadcast %265 : vector<2x8x1xf32> to vector<2x8x8xf32>
    %267 = arith.mulf %262, %266 : vector<2x8x8xf32>
    "tpu.trace_start"() <{level = 10 : i32, message = "bqk,bkd->bqd"}> : () -> ()
    %cst_133 = arith.constant dense<0.000000e+00> : vector<2x8x8xf32>
    %268 = tpu.matmul %267, %255, %cst_133 {dimension_numbers = #tpu.dot_dimension_numbers<[2], [1], [1], [2], [0, 0, 0, 1, 1, 2], [0], [0]>} : vector<2x8x8xf32>, vector<2x8x8xf32>, vector<2x8x8xf32> -> vector<2x8x8xf32>
    "tpu.trace_stop"() : () -> ()
    %269 = vector.shape_cast %268 : vector<2x8x8xf32> to vector<16x8xf32>
    %c1_134 = arith.constant 1 : index
    %c1_135 = arith.constant 1 : index
    %c0_136 = arith.constant 0 : index
    %c0_137 = arith.constant 0 : index
    %270 = vector.load %arg7[%c1_134, %c1_135, %c0_136, %c0_137] : memref<2x4x8x32xf32, #tpu.memory_space<vmem>>, vector<1x1x8x32xf32>
    %271 = vector.shape_cast %270 : vector<1x1x8x32xf32> to vector<8x32xf32>
    %cst_138 = arith.constant dense<0.000000e+00> : vector<16x32xf32>
    %272 = tpu.matmul %269, %271, %cst_138 {dimension_numbers = #tpu.dot_dimension_numbers<[1], [0], [0], [1], [0, 0, 1, 1], [], []>} : vector<16x8xf32>, vector<8x32xf32>, vector<16x32xf32> -> vector<16x32xf32>
    %273 = arith.addf %249, %272 : vector<16x32xf32>
    %274 = vector.extract_strided_slice %218 {offsets = [0, 16], sizes = [16, 8], strides = [1, 1]} : vector<16x32xf32> to vector<16x8xf32>
    %275 = vector.shape_cast %274 : vector<16x8xf32> to vector<2x8x8xf32>
    %276 = vector.extract_strided_slice %221 {offsets = [0, 16], sizes = [16, 8], strides = [1, 1]} : vector<16x32xf32> to vector<16x8xf32>
    %277 = vector.shape_cast %276 : vector<16x8xf32> to vector<2x8x8xf32>
    %278 = vector.extract_strided_slice %224 {offsets = [0, 16], sizes = [16, 8], strides = [1, 1]} : vector<16x32xf32> to vector<16x8xf32>
    %279 = vector.shape_cast %278 : vector<16x8xf32> to vector<2x8x8xf32>
    "tpu.trace_start"() <{level = 10 : i32, message = "bqd,bkd->bqk"}> : () -> ()
    %cst_139 = arith.constant dense<0.000000e+00> : vector<2x8x8xf32>
    %280 = tpu.matmul %275, %277, %cst_139 {dimension_numbers = #tpu.dot_dimension_numbers<[2], [2], [1], [1], [0, 0, 0, 1, 1, 1], [0], [0]>} : vector<2x8x8xf32>, vector<2x8x8xf32>, vector<2x8x8xf32> -> vector<2x8x8xf32>
    "tpu.trace_stop"() : () -> ()
    %281 = arith.addf %280, %0 : vector<2x8x8xf32>
    %cst_140 = arith.constant dense<0xFF800000> : vector<2x8xf32>
    %282 = vector.multi_reduction <maximumf>, %281, %cst_140 [2] : vector<2x8x8xf32> to vector<2x8xf32>
    %283 = vector.shape_cast %282 : vector<2x8xf32> to vector<2x8x1xf32>
    %284 = vector.broadcast %283 : vector<2x8x1xf32> to vector<2x8x8xf32>
    %285 = arith.subf %281, %284 : vector<2x8x8xf32>
    %286 = math.exp %285 : vector<2x8x8xf32>
    %cst_141 = arith.constant dense<0.000000e+00> : vector<2x8xf32>
    %287 = vector.multi_reduction <add>, %286, %cst_141 [2] : vector<2x8x8xf32> to vector<2x8xf32>
    %288 = vector.shape_cast %287 : vector<2x8xf32> to vector<2x8x1xf32>
    %289 = tpu.reciprocal %288 {approx = true} : vector<2x8x1xf32> -> vector<2x8x1xf32>
    %290 = vector.broadcast %289 : vector<2x8x1xf32> to vector<2x8x8xf32>
    %291 = arith.mulf %286, %290 : vector<2x8x8xf32>
    "tpu.trace_start"() <{level = 10 : i32, message = "bqk,bkd->bqd"}> : () -> ()
    %cst_142 = arith.constant dense<0.000000e+00> : vector<2x8x8xf32>
    %292 = tpu.matmul %291, %279, %cst_142 {dimension_numbers = #tpu.dot_dimension_numbers<[2], [1], [1], [2], [0, 0, 0, 1, 1, 2], [0], [0]>} : vector<2x8x8xf32>, vector<2x8x8xf32>, vector<2x8x8xf32> -> vector<2x8x8xf32>
    "tpu.trace_stop"() : () -> ()
    %293 = vector.shape_cast %292 : vector<2x8x8xf32> to vector<16x8xf32>
    %c1_143 = arith.constant 1 : index
    %c2_144 = arith.constant 2 : index
    %c0_145 = arith.constant 0 : index
    %c0_146 = arith.constant 0 : index
    %294 = vector.load %arg7[%c1_143, %c2_144, %c0_145, %c0_146] : memref<2x4x8x32xf32, #tpu.memory_space<vmem>>, vector<1x1x8x32xf32>
    %295 = vector.shape_cast %294 : vector<1x1x8x32xf32> to vector<8x32xf32>
    %cst_147 = arith.constant dense<0.000000e+00> : vector<16x32xf32>
    %296 = tpu.matmul %293, %295, %cst_147 {dimension_numbers = #tpu.dot_dimension_numbers<[1], [0], [0], [1], [0, 0, 1, 1], [], []>} : vector<16x8xf32>, vector<8x32xf32>, vector<16x32xf32> -> vector<16x32xf32>
    %297 = arith.addf %273, %296 : vector<16x32xf32>
    %298 = vector.extract_strided_slice %218 {offsets = [0, 24], sizes = [16, 8], strides = [1, 1]} : vector<16x32xf32> to vector<16x8xf32>
    %299 = vector.shape_cast %298 : vector<16x8xf32> to vector<2x8x8xf32>
    %300 = vector.extract_strided_slice %221 {offsets = [0, 24], sizes = [16, 8], strides = [1, 1]} : vector<16x32xf32> to vector<16x8xf32>
    %301 = vector.shape_cast %300 : vector<16x8xf32> to vector<2x8x8xf32>
    %302 = vector.extract_strided_slice %224 {offsets = [0, 24], sizes = [16, 8], strides = [1, 1]} : vector<16x32xf32> to vector<16x8xf32>
    %303 = vector.shape_cast %302 : vector<16x8xf32> to vector<2x8x8xf32>
    "tpu.trace_start"() <{level = 10 : i32, message = "bqd,bkd->bqk"}> : () -> ()
    %cst_148 = arith.constant dense<0.000000e+00> : vector<2x8x8xf32>
    %304 = tpu.matmul %299, %301, %cst_148 {dimension_numbers = #tpu.dot_dimension_numbers<[2], [2], [1], [1], [0, 0, 0, 1, 1, 1], [0], [0]>} : vector<2x8x8xf32>, vector<2x8x8xf32>, vector<2x8x8xf32> -> vector<2x8x8xf32>
    "tpu.trace_stop"() : () -> ()
    %305 = arith.addf %304, %0 : vector<2x8x8xf32>
    %cst_149 = arith.constant dense<0xFF800000> : vector<2x8xf32>
    %306 = vector.multi_reduction <maximumf>, %305, %cst_149 [2] : vector<2x8x8xf32> to vector<2x8xf32>
    %307 = vector.shape_cast %306 : vector<2x8xf32> to vector<2x8x1xf32>
    %308 = vector.broadcast %307 : vector<2x8x1xf32> to vector<2x8x8xf32>
    %309 = arith.subf %305, %308 : vector<2x8x8xf32>
    %310 = math.exp %309 : vector<2x8x8xf32>
    %cst_150 = arith.constant dense<0.000000e+00> : vector<2x8xf32>
    %311 = vector.multi_reduction <add>, %310, %cst_150 [2] : vector<2x8x8xf32> to vector<2x8xf32>
    %312 = vector.shape_cast %311 : vector<2x8xf32> to vector<2x8x1xf32>
    %313 = tpu.reciprocal %312 {approx = true} : vector<2x8x1xf32> -> vector<2x8x1xf32>
    %314 = vector.broadcast %313 : vector<2x8x1xf32> to vector<2x8x8xf32>
    %315 = arith.mulf %310, %314 : vector<2x8x8xf32>
    "tpu.trace_start"() <{level = 10 : i32, message = "bqk,bkd->bqd"}> : () -> ()
    %cst_151 = arith.constant dense<0.000000e+00> : vector<2x8x8xf32>
    %316 = tpu.matmul %315, %303, %cst_151 {dimension_numbers = #tpu.dot_dimension_numbers<[2], [1], [1], [2], [0, 0, 0, 1, 1, 2], [0], [0]>} : vector<2x8x8xf32>, vector<2x8x8xf32>, vector<2x8x8xf32> -> vector<2x8x8xf32>
    "tpu.trace_stop"() : () -> ()
    %317 = vector.shape_cast %316 : vector<2x8x8xf32> to vector<16x8xf32>
    %c1_152 = arith.constant 1 : index
    %c3_153 = arith.constant 3 : index
    %c0_154 = arith.constant 0 : index
    %c0_155 = arith.constant 0 : index
    %318 = vector.load %arg7[%c1_152, %c3_153, %c0_154, %c0_155] : memref<2x4x8x32xf32, #tpu.memory_space<vmem>>, vector<1x1x8x32xf32>
    %319 = vector.shape_cast %318 : vector<1x1x8x32xf32> to vector<8x32xf32>
    %cst_156 = arith.constant dense<0.000000e+00> : vector<16x32xf32>
    %320 = tpu.matmul %317, %319, %cst_156 {dimension_numbers = #tpu.dot_dimension_numbers<[1], [0], [0], [1], [0, 0, 1, 1], [], []>} : vector<16x8xf32>, vector<8x32xf32>, vector<16x32xf32> -> vector<16x32xf32>
    %321 = arith.addf %297, %320 : vector<16x32xf32>
    %c1_157 = arith.constant 1 : index
    %c0_158 = arith.constant 0 : index
    %c0_159 = arith.constant 0 : index
    %322 = vector.load %arg8[%c1_157, %c0_158, %c0_159] : memref<2x1x32xf32, #tpu.memory_space<vmem>>, vector<1x1x32xf32>
    %323 = vector.shape_cast %322 : vector<1x1x32xf32> to vector<1x32xf32>
    %324 = vector.broadcast %323 : vector<1x32xf32> to vector<16x32xf32>
    %325 = arith.addf %321, %324 : vector<16x32xf32>
    %326 = arith.addf %325, %207 : vector<16x32xf32>
    %c1_160 = arith.constant 1 : index
    %c0_161 = arith.constant 0 : index
    %c0_162 = arith.constant 0 : index
    %327 = vector.load %arg9[%c1_160, %c0_161, %c0_162] : memref<2x1x32xf32, #tpu.memory_space<vmem>>, vector<1x1x32xf32>
    %328 = vector.shape_cast %327 : vector<1x1x32xf32> to vector<1x32xf32>
    %c1_163 = arith.constant 1 : index
    %c0_164 = arith.constant 0 : index
    %c0_165 = arith.constant 0 : index
    %329 = vector.load %arg10[%c1_163, %c0_164, %c0_165] : memref<2x1x32xf32, #tpu.memory_space<vmem>>, vector<1x1x32xf32>
    %330 = vector.shape_cast %329 : vector<1x1x32xf32> to vector<1x32xf32>
    %cst_166 = arith.constant dense<0.000000e+00> : vector<16xf32>
    %331 = vector.multi_reduction <add>, %326, %cst_166 [1] : vector<16x32xf32> to vector<16xf32>
    %332 = vector.shape_cast %331 : vector<16xf32> to vector<16x1xf32>
    %cst_167 = arith.constant 3.200000e+01 : f32
    %333 = vector.broadcast %cst_167 : f32 to vector<16x1xf32>
    %334 = arith.divf %332, %333 : vector<16x1xf32>
    %335 = vector.broadcast %334 : vector<16x1xf32> to vector<16x32xf32>
    %336 = arith.subf %326, %335 : vector<16x32xf32>
    %337 = arith.mulf %336, %336 : vector<16x32xf32>
    %cst_168 = arith.constant dense<0.000000e+00> : vector<16xf32>
    %338 = vector.multi_reduction <add>, %337, %cst_168 [1] : vector<16x32xf32> to vector<16xf32>
    %339 = vector.shape_cast %338 : vector<16xf32> to vector<16x1xf32>
    %cst_169 = arith.constant 3.200000e+01 : f32
    %340 = vector.broadcast %cst_169 : f32 to vector<16x1xf32>
    %341 = arith.divf %339, %340 : vector<16x1xf32>
    %cst_170 = arith.constant 9.99999996E-13 : f32
    %342 = vector.broadcast %cst_170 : f32 to vector<16x1xf32>
    %343 = arith.addf %341, %342 : vector<16x1xf32>
    %344 = math.rsqrt %343 : vector<16x1xf32>
    %345 = vector.broadcast %344 : vector<16x1xf32> to vector<16x32xf32>
    %346 = arith.mulf %336, %345 : vector<16x32xf32>
    %347 = vector.broadcast %328 : vector<1x32xf32> to vector<16x32xf32>
    %348 = arith.mulf %346, %347 : vector<16x32xf32>
    %349 = vector.broadcast %330 : vector<1x32xf32> to vector<16x32xf32>
    %350 = arith.addf %348, %349 : vector<16x32xf32>
    %c1_171 = arith.constant 1 : index
    %c0_172 = arith.constant 0 : index
    %c0_173 = arith.constant 0 : index
    %351 = vector.load %arg11[%c1_171, %c0_172, %c0_173] : memref<2x32x64xf32, #tpu.memory_space<vmem>>, vector<1x32x64xf32>
    %352 = vector.shape_cast %351 : vector<1x32x64xf32> to vector<32x64xf32>
    %cst_174 = arith.constant dense<0.000000e+00> : vector<16x64xf32>
    %353 = tpu.matmul %350, %352, %cst_174 {dimension_numbers = #tpu.dot_dimension_numbers<[1], [0], [0], [1], [0, 0, 1, 1], [], []>} : vector<16x32xf32>, vector<32x64xf32>, vector<16x64xf32> -> vector<16x64xf32>
    %c1_175 = arith.constant 1 : index
    %c0_176 = arith.constant 0 : index
    %c0_177 = arith.constant 0 : index
    %354 = vector.load %arg12[%c1_175, %c0_176, %c0_177] : memref<2x1x64xf32, #tpu.memory_space<vmem>>, vector<1x1x64xf32>
    %355 = vector.shape_cast %354 : vector<1x1x64xf32> to vector<1x64xf32>
    %356 = vector.broadcast %355 : vector<1x64xf32> to vector<16x64xf32>
    %357 = arith.addf %353, %356 : vector<16x64xf32>
    %cst_178 = arith.constant 5.000000e-01 : f32
    %358 = vector.broadcast %cst_178 : f32 to vector<16x64xf32>
    %359 = arith.mulf %358, %357 : vector<16x64xf32>
    %cst_179 = arith.constant 0.707106769 : f32
    %360 = vector.broadcast %cst_179 : f32 to vector<16x64xf32>
    %361 = arith.mulf %357, %360 : vector<16x64xf32>
    %362 = math.erf %361 : vector<16x64xf32>
    %cst_180 = arith.constant 1.000000e+00 : f32
    %363 = vector.broadcast %cst_180 : f32 to vector<16x64xf32>
    %364 = arith.addf %363, %362 : vector<16x64xf32>
    %365 = arith.mulf %359, %364 : vector<16x64xf32>
    %c1_181 = arith.constant 1 : index
    %c0_182 = arith.constant 0 : index
    %c0_183 = arith.constant 0 : index
    %366 = vector.load %arg13[%c1_181, %c0_182, %c0_183] : memref<2x64x32xf32, #tpu.memory_space<vmem>>, vector<1x64x32xf32>
    %367 = vector.shape_cast %366 : vector<1x64x32xf32> to vector<64x32xf32>
    %cst_184 = arith.constant dense<0.000000e+00> : vector<16x32xf32>
    %368 = tpu.matmul %365, %367, %cst_184 {dimension_numbers = #tpu.dot_dimension_numbers<[1], [0], [0], [1], [0, 0, 1, 1], [], []>} : vector<16x64xf32>, vector<64x32xf32>, vector<16x32xf32> -> vector<16x32xf32>
    %c1_185 = arith.constant 1 : index
    %c0_186 = arith.constant 0 : index
    %c0_187 = arith.constant 0 : index
    %369 = vector.load %arg14[%c1_185, %c0_186, %c0_187] : memref<2x1x32xf32, #tpu.memory_space<vmem>>, vector<1x1x32xf32>
    %370 = vector.shape_cast %369 : vector<1x1x32xf32> to vector<1x32xf32>
    %371 = vector.broadcast %370 : vector<1x32xf32> to vector<16x32xf32>
    %372 = arith.addf %368, %371 : vector<16x32xf32>
    %373 = arith.addf %350, %372 : vector<16x32xf32>
    %c1_188 = arith.constant 1 : index
    %c0_189 = arith.constant 0 : index
    %c0_190 = arith.constant 0 : index
    %374 = vector.load %arg15[%c1_188, %c0_189, %c0_190] : memref<2x1x32xf32, #tpu.memory_space<vmem>>, vector<1x1x32xf32>
    %375 = vector.shape_cast %374 : vector<1x1x32xf32> to vector<1x32xf32>
    %c1_191 = arith.constant 1 : index
    %c0_192 = arith.constant 0 : index
    %c0_193 = arith.constant 0 : index
    %376 = vector.load %arg16[%c1_191, %c0_192, %c0_193] : memref<2x1x32xf32, #tpu.memory_space<vmem>>, vector<1x1x32xf32>
    %377 = vector.shape_cast %376 : vector<1x1x32xf32> to vector<1x32xf32>
    %cst_194 = arith.constant dense<0.000000e+00> : vector<16xf32>
    %378 = vector.multi_reduction <add>, %373, %cst_194 [1] : vector<16x32xf32> to vector<16xf32>
    %379 = vector.shape_cast %378 : vector<16xf32> to vector<16x1xf32>
    %cst_195 = arith.constant 3.200000e+01 : f32
    %380 = vector.broadcast %cst_195 : f32 to vector<16x1xf32>
    %381 = arith.divf %379, %380 : vector<16x1xf32>
    %382 = vector.broadcast %381 : vector<16x1xf32> to vector<16x32xf32>
    %383 = arith.subf %373, %382 : vector<16x32xf32>
    %384 = arith.mulf %383, %383 : vector<16x32xf32>
    %cst_196 = arith.constant dense<0.000000e+00> : vector<16xf32>
    %385 = vector.multi_reduction <add>, %384, %cst_196 [1] : vector<16x32xf32> to vector<16xf32>
    %386 = vector.shape_cast %385 : vector<16xf32> to vector<16x1xf32>
    %cst_197 = arith.constant 3.200000e+01 : f32
    %387 = vector.broadcast %cst_197 : f32 to vector<16x1xf32>
    %388 = arith.divf %386, %387 : vector<16x1xf32>
    %cst_198 = arith.constant 9.99999996E-13 : f32
    %389 = vector.broadcast %cst_198 : f32 to vector<16x1xf32>
    %390 = arith.addf %388, %389 : vector<16x1xf32>
    %391 = math.rsqrt %390 : vector<16x1xf32>
    %392 = vector.broadcast %391 : vector<16x1xf32> to vector<16x32xf32>
    %393 = arith.mulf %383, %392 : vector<16x32xf32>
    %394 = vector.broadcast %375 : vector<1x32xf32> to vector<16x32xf32>
    %395 = arith.mulf %393, %394 : vector<16x32xf32>
    %396 = vector.broadcast %377 : vector<1x32xf32> to vector<16x32xf32>
    %397 = arith.addf %395, %396 : vector<16x32xf32>
    %c1_199 = arith.constant 1 : index
    %c0_200 = arith.constant 0 : index
    %c0_201 = arith.constant 0 : index
    %398 = vector.load %arg17[%c1_199, %c0_200, %c0_201] : memref<2x16x32xf32, #tpu.memory_space<vmem>>, vector<1x16x32xf32>
    %399 = vector.shape_cast %398 : vector<1x16x32xf32> to vector<16x32xf32>
    %400 = vector.shape_cast %397 : vector<16x32xf32> to vector<1x16x32xf32>
    tpu.vector_store %arg17[%c1_199, %c0_200, %c0_201], %400 {strides = array<i32>} : memref<2x16x32xf32, #tpu.memory_space<vmem>>, vector<1x16x32xf32>,
    %c1_202 = arith.constant 1 : index
    %c0_203 = arith.constant 0 : index
    %c0_204 = arith.constant 0 : index
    %401 = vector.load %arg18[%c1_202, %c0_203, %c0_204] : memref<2x16x32xf32, #tpu.memory_space<vmem>>, vector<1x16x32xf32>
    %402 = vector.shape_cast %401 : vector<1x16x32xf32> to vector<16x32xf32>
    %403 = vector.shape_cast %372 : vector<16x32xf32> to vector<1x16x32xf32>
    tpu.vector_store %arg18[%c1_202, %c0_203, %c0_204], %403 {strides = array<i32>} : memref<2x16x32xf32, #tpu.memory_space<vmem>>, vector<1x16x32xf32>,
    return
  }
}

</mosaic_0001>

<bundles_post_ra>
// kernel: bert_forward.1
= control target key start
LH: loop header
LB: loop body
LE: loop exit
PB: predicated region body
PF: predicated region fallthrough
CT: control target
= control target key end

     0   :  { %vm64_vm0 = vcmask 261120   ;;  %v2437_v4 = vmov 32.0   ;;  %vm215_vm8 = vcmask 64512   ;;  %s2438_s19 = smov 120   ;;  %s2440_s23 = smov 104   ;;  %s3168_s0 = inlined_call_operand.vmem [shape: f32[16,32], index: 0, kind: input, shape index: {}]   ;;  %s3169_s2 = inlined_call_operand.vmem [shape: f32[1,32], index: 2, kind: input, shape index: {}]   ;;  %s3170_s3 = inlined_call_operand.vmem [shape: f32[1,32], index: 3, kind: input, shape index: {}]   ;;  %s3171_s4 = inlined_call_operand.vmem [shape: f32[2,32,32], index: 4, kind: input, shape index: {}]   ;;  %s3172_s5 = inlined_call_operand.vmem [shape: f32[2,32,32], index: 5, kind: input, shape index: {}]   ;;  %s3173_s6 = inlined_call_operand.vmem [shape: f32[2,32,32], index: 6, kind: input, shape index: {}]   ;;  %s3174_s1 = inlined_call_operand.vmem [shape: f32[2,8,8], index: 1, kind: input, shape index: {}]   ;;  %s3175_s7 = inlined_call_operand.vmem [shape: f32[2,4,8,32], index: 7, kind: input, shape index: {}]   ;;  %s3176_s8 = inlined_call_operand.vmem [shape: f32[2,1,32], index: 8, kind: input, shape index: {}]   ;;  %s3177_s9 = inlined_call_operand.vmem [shape: f32[2,1,32], index: 9, kind: input, shape index: {}]   ;;  %s3178_s10 = inlined_call_operand.vmem [shape: f32[2,1,32], index: 10, kind: input, shape index: {}]   ;;  %s3179_s12 = inlined_call_operand.vmem [shape: f32[2,1,64], index: 12, kind: input, shape index: {}]   ;;  %s3180_s11 = inlined_call_operand.vmem [shape: f32[2,32,64], index: 11, kind: input, shape index: {}]   ;;  %s3181_s14 = inlined_call_operand.vmem [shape: f32[2,1,32], index: 14, kind: input, shape index: {}]   ;;  %s3182_s13 = inlined_call_operand.vmem [shape: f32[2,64,32], index: 13, kind: input, shape index: {}]   ;;  %s3183_s18 = inlined_call_operand.vmem [shape: f32[2,16,32], index: 18, kind: output, shape index: {1}]   ;;  %s3184_s15 = inlined_call_operand.vmem [shape: f32[2,1,32], index: 15, kind: input, shape index: {}]   ;;  %s3185_s16 = inlined_call_operand.vmem [shape: f32[2,1,32], index: 16, kind: input, shape index: {}]   ;;  %s3186_s17 = inlined_call_operand.vmem [shape: f32[2,16,32], index: 17, kind: output, shape index: {0}]  }
   0x1   :  { %3188 = sst [smem:[#allocation2_spill]] %s3168_s0  ;;  %2341 = vrcp.f32 %v2437_v4  ;;  %v129_v21 = vld [vmem:[%s3171_s4 + $0x18] sm:$0xff]  ;;  %v128_v24 = vld [vmem:[%s3171_s4 + $0x10] sm:$0xff]  ;;  %v127_v27 = vld [vmem:[%s3171_s4 + $0x8] sm:$0xff] }
   0x2   :  { %3189 = sst [smem:[#allocation3_spill]] %s3169_s2  ;;  %v164_v22 = vld [vmem:[%s3172_s5 + $0x18] sm:$0xff]  ;;  %148 = vmatpush.msra.mxu0 %v129_v21  ;;  %v163_v25 = vld [vmem:[%s3172_s5 + $0x10] sm:$0xff]  ;;  %v162_v28 = vld [vmem:[%s3172_s5 + $0x8] sm:$0xff] }
   0x3   :  { %3190 = sst [smem:[#allocation4_spill]] %s3170_s3  ;;  %v191_v23 = vld [vmem:[%s3173_s6 + $0x18] sm:$0xff]  ;;  %177 = vmatpush.msra.mxu1 %v164_v22  ;;  %v190_v26 = vld [vmem:[%s3173_s6 + $0x10] sm:$0xff]  ;;  %v189_v29 = vld [vmem:[%s3173_s6 + $0x8] sm:$0xff]  ;;  %s2439_s3 = smov 112  }
   0x4   :  { %s3191_s29 = sld [smem:[#allocation2_spill]]  ;;  %204 = vmatpush.msra.mxu2 %v191_v23  ;;  %149 = vmatpush.msra.mxu0 %v128_v24  ;;  %v126_v30 = vld [vmem:[%s3171_s4] sm:$0xff] }
   0x5   :  { %178 = vmatpush.msra.mxu1 %v163_v25  ;;  %v161_v31 = vld [vmem:[%s3172_s5] sm:$0xff]  ;;  %s3192_s28 = sld [smem:[#allocation3_spill]] }
   0x6   :  { %205 = vmatpush.msra.mxu2 %v190_v26  ;;  %150 = vmatpush.msra.mxu0 %v127_v27  ;;  %v188_v32 = vld [vmem:[%s3173_s6] sm:$0xff]  ;;  %s3193_s0 = sld [smem:[#allocation4_spill]] }
   0x7   :  { %v2342_v5 = vpop.eup %2341  ;;  %179 = vmatpush.msra.mxu1 %v162_v28 }
   0x8   :  { %v72_v6 = vmul.f32 32.0, %v2342_v5  ;;  %vm76_vm1 = vweird.f32 %v2342_v5  ;;  %206 = vmatpush.msra.mxu2 %v189_v29  ;;  %151 = vmatpush.msra.mxu0 %v126_v30 }
   0x9   :  { %180 = vmatpush.msra.mxu1 %v161_v31 }
   0xa   :  { %v60_v0 = vld [vmem:[%s3191_s29] sm:$0xff]  ;;  %v61_v2 = vld [vmem:[%s3191_s29 + $0x8] sm:$0xff]  ;;  %v73_v7 = vsub.f32 1.0, %v72_v6  ;;  %207 = vmatpush.msra.mxu2 %v188_v32 }
   0xb   :  { %v65_v1 = vsel %vm64_vm0, %v60_v0, 0.0  ;;  %v68_v3 = vsel %vm64_vm0, %v61_v2, 0.0  ;;  %v2325_v47 = vld [vmem:[%s3192_s28] ss:$0 sm:$0xff] }
   0xc   :  { %66 = vadd.xlane.f32.xlu0 %v65_v1  ;;  %v74_v8 = vmul.f32 %v2342_v5, %v73_v7  ;;  %v2326_v51 = vld [vmem:[%s3193_s0] ss:$0 sm:$0xff] }
   0xe   :  { %v75_v9 = vadd.f32 %v2342_v5, %v74_v8 }
  0x10   :  { %v2544_v10 = vsel %vm76_vm1, %v2342_v5, %v75_v9  ;;  %v2644_v9 = vld [vmem:[%s3174_s1] sm:$0xff] }
  0x14   :  { %69 = vadd.xlane.f32.xlu0 %v68_v3 }
  0x7f   :  { %v67_v11 = vpop.xlane.xlu0 %66 }
  0x80   :  { %v78_v12 = vmul.f32 %v2544_v10, %v67_v11 }
  0x82   :  { %v80_v13 = vsub.f32 %v60_v0, %v78_v12 }
  0x84   :  { %v82_v14 = vmul.f32 %v80_v13, %v80_v13 }
  0x86   :  { %v84_v15 = vsel %vm64_vm0, %v82_v14, 0.0  ;;  %v2651_v14 = vld [vmem:[%s3174_s1 + $0x8] sm:$0xff] }
  0x87   :  { %85 = vadd.xlane.f32.xlu1 %v84_v15  ;;  %v70_v16 = vpop.xlane.xlu0 %69 }
  0x88   :  { %v79_v17 = vmul.f32 %v2544_v10, %v70_v16 }
  0x8a   :  { %v2549_v18 = vsub.f32 %v61_v2, %v79_v17 }
  0x8c   :  { %v83_v19 = vmul.f32 %v2549_v18, %v2549_v18 }
  0x8e   :  { %v87_v20 = vsel %vm64_vm0, %v83_v19, 0.0 }
  0x8f   :  { %88 = vadd.xlane.f32.xlu1 %v87_v20 }
  0xfa   :  { %v86_v33 = vpop.xlane.xlu1 %85 }
  0xfb   :  { %v90_v34 = vmul.f32 %v86_v33, %v2544_v10 }
  0xfd   :  { %v92_v35 = vadd.f32 1e-12, %v90_v34 }
  0xff   :  { %2343 = vrsqrt.f32 %v92_v35  ;;  %vm100_vm3 = vweird.f32 %v92_v35 }
 0x102   :  { %v89_v36 = vpop.xlane.xlu1 %88 }
 0x103   :  { %v91_v37 = vmul.f32 %v89_v36, %v2544_v10 }
 0x105   :  { %v2344_v38 = vpop.eup %2343  ;;  %v93_v39 = vadd.f32 1e-12, %v91_v37 }
 0x106   :  { %v95_v40 = vmul.f32 %v2344_v38, %v92_v35  ;;  %vm101_vm2 = vweird.f32 %v2344_v38 }
 0x107   :  { %2345 = vrsqrt.f32 %v93_v39  ;;  %vm102_vm4 = vmor %vm100_vm3, %vm101_vm2  ;;  %vm110_vm5 = vweird.f32 %v93_v39  ;;  %vm1056_vm3 = vcmask 523264  }
 0x108   :  { %v96_v41 = vmul.f32 %v2344_v38, %v95_v40  ;;  %v336_v40 = vld [vmem:[%s3175_s7] sm:$0xff] }
 0x10a   :  { %v97_v42 = vmul.f32 0.5, %v96_v41 }
 0x10c   :  { %v98_v43 = vsub.f32 1.5, %v97_v42 }
 0x10d   :  { %v2346_v44 = vpop.eup %2345 }
 0x10e   :  { %v99_v45 = vmul.f32 %v2344_v38, %v98_v43  ;;  %v105_v46 = vmul.f32 %v2346_v44, %v93_v39  ;;  %vm111_vm6 = vweird.f32 %v2346_v44 }
 0x10f   :  { %vm112_vm7 = vmor %vm110_vm5, %vm111_vm6 }
 0x110   :  { %v103_v48 = vsel %vm102_vm4, %v2344_v38, %v99_v45  ;;  %v106_v49 = vmul.f32 %v2346_v44, %v105_v46 }
 0x111   :  { %v114_v50 = vmul.f32 %v103_v48, %v80_v13 }
 0x112   :  { %v107_v52 = vmul.f32 0.5, %v106_v49 }
 0x113   :  { %v119_v53 = vmul.f32 %v2325_v47, %v114_v50 }
 0x114   :  { %v108_v54 = vsub.f32 1.5, %v107_v52 }
 0x115   :  { %v2598_v55 = vadd.f32 %v2326_v51, %v119_v53 }
 0x116   :  { %v109_v56 = vmul.f32 %v2346_v44, %v108_v54 }
 0x117   :  { %2191 = vmatmul.msk.f32.vlgmr.msra.gmra.mxu0 %vm64_vm0, %v2598_v55  ;;  %2193 = vmatmul.msk.f32.vlgmr.msra.gmra.mxu1 %vm64_vm0, %v2598_v55 }
 0x118   :  { %v113_v57 = vsel %vm112_vm7, %v2346_v44, %v109_v56  ;;  %2195 = vmatmul.msk.f32.vlgmr.msra.gmra.mxu2 %vm64_vm0, %v2598_v55 }
 0x119   :  { %v115_v58 = vmul.f32 %v113_v57, %v2549_v18 }
 0x11b   :  { %v120_v59 = vmul.f32 %v2325_v47, %v115_v58 }
 0x11d   :  { %v2607_v60 = vadd.f32 %v2326_v51, %v120_v59 }
 0x11f   :  { %2192 = vmatmul.msk.f32.gmra.mxu0 %vm64_vm0, %v2607_v60  ;;  %2194 = vmatmul.msk.f32.gmra.mxu1 %vm64_vm0, %v2607_v60 }
 0x120   :  { %2196 = vmatmul.msk.f32.gmra.mxu2 %vm64_vm0, %v2607_v60 }
 0x194   :  { %v153_v61 = vpop.f32.mrf.mxu0  ;;  %v2615_v62 = vpop.f32.mrf.mxu1 }
 0x195   :  { %v2617_v63 = vmul.f32 0.17677669, %v153_v61  ;;  %339 = vrot.lane.b32.xlu2 %v2615_v62, %s2438_s19  ;;  %2197 = vmatpush.xpose.msk.msrb.mxu0 %vm215_vm8, %v2615_v62 }
 0x198   :  { %2198 = vmatmul.msk.f32.vlgmr.msrb.gmra.mxu0 %vm215_vm8, %v2617_v63 }
 0x19b   :  { %v2625_v0 = vpop.f32.mrf.mxu2 }
 0x19c   :  { %v156_v1 = vpop.f32.mrf.mxu0  ;;  %v185_v2 = vpop.f32.mrf.mxu1 }
 0x19d   :  { %v160_v3 = vmul.f32 0.17677669, %v156_v1  ;;  %337 = vrot.lane.b32.xlu2 %v2617_v63, %s2438_s19  ;;  %367 = vrot.lane.b32.xlu0 %v185_v2, %s2438_s19 }
 0x19e   :  { %2199 = vmatpush.xpose.msk.msra.mxu3 %vm215_vm8, %v185_v2 }
 0x19f   :  { %365 = vrot.lane.b32.xlu1 %v160_v3, %s2438_s19 }
 0x1a1   :  { %2200 = vmatmul.msk.f32.vlgmr.msra.gmra.mxu3 %vm215_vm8, %v160_v3 }
 0x1a2   :  { %308 = vmatpush.msrb.mxu3 %v2625_v0 }
 0x1a3   :  { %v2634_v4 = vpop.f32.mrf.mxu2 }
 0x1a4   :  { %331 = vmatpush.msra.mxu0 %v2634_v4 }
 0x1ef   :  { %v340_v5 = vpop.permute.xlu2 %339 }
 0x1f0   :  { %2203 = vmatpush.xpose.msk.msrb.mxu1 %vm215_vm8, %v340_v5 }
 0x1f7   :  { %v338_v6 = vpop.permute.xlu2 %337 }
 0x1f8   :  { %2204 = vmatmul.msk.f32.vlgmr.msrb.gmra.mxu1 %vm215_vm8, %v338_v6 }
 0x20f   :  { %v368_v7 = vpop.permute.xlu0 %367 }
 0x210   :  { %2205 = vmatpush.xpose.msk.msrb.mxu2 %vm215_vm8, %v368_v7  ;;  %v2209_v7 = vld [vmem:[%s3175_s7 + $0x8] sm:$0xff] }
 0x211   :  { %v366_v8 = vpop.permute.xlu1 %365  ;;  %492 = vmatpush.msra.mxu1 %v2209_v7 }
 0x213   :  { %2206 = vmatmul.msk.f32.vlgmr.msrb.gmra.mxu2 %vm215_vm8, %v366_v8 }
 0x214   :  { %521 = vmatpush.msra.mxu2 %v336_v40 }
 0x215   :  { %v239_v11 = vpop.f32.mrf.mxu0 }
 0x216   :  { %v240_v12 = vadd.f32 %v239_v11, %v2644_v9 }
 0x218   :  { %v268_v13 = vsel %vm215_vm8, %v240_v12, -inf }
 0x219   :  { %269 = vmax.xlane.f32.xlu2 %v268_v13 }
 0x224   :  { %v265_v15 = vpop.f32.mrf.mxu3 }
 0x225   :  { %v266_v16 = vadd.f32 %v265_v15, %v2651_v14 }
 0x227   :  { %v271_v17 = vsel %vm215_vm8, %v266_v16, -inf }
 0x228   :  { %272 = vmax.xlane.f32.xlu0 %v271_v17 }
 0x23c   :  { %416 = vrot.lane.b32.xlu0 %v2625_v0, %s2438_s19 }
 0x275   :  { %v362_v18 = vpop.f32.mrf.mxu1 }
 0x276   :  { %v363_v19 = vadd.f32 %v362_v18, %v2644_v9 }
 0x278   :  { %v393_v20 = vsel %vm215_vm8, %v363_v19, -inf }
 0x279   :  { %394 = vmax.xlane.f32.xlu1 %v393_v20 }
 0x28c   :  { %v270_v21 = vpop.xlane.xlu2 %269 }
 0x28d   :  { %v274_v22 = vsub.f32 %v240_v12, %v270_v21 }
 0x28f   :  { %v276_v23 = vmul.f32 1.442695, %v274_v22 }
 0x291   :  { %2347 = vpow2.f32 %v276_v23 }
 0x292   :  { %529 = vrot.lane.b32.xlu1 %v2617_v63, %s2439_s3 }
 0x296   :  { %v390_v24 = vpop.f32.mrf.mxu2 }
 0x297   :  { %v2348_v25 = vpop.eup %2347  ;;  %v391_v26 = vadd.f32 %v390_v24, %v2651_v14 }
 0x298   :  { %v280_v27 = vsel %vm215_vm8, %v2348_v25, 0.0 }
 0x299   :  { %281 = vadd.xlane.f32.xlu2 %v280_v27  ;;  %v396_v28 = vsel %vm215_vm8, %v391_v26, -inf }
 0x29a   :  { %443 = vrot.lane.b32.xlu1 %v2634_v4, %s2438_s19  ;;  %397 = vmax.xlane.f32.xlu0 %v396_v28 }
 0x29b   :  { %v273_v29 = vpop.xlane.xlu0 %272 }
 0x29c   :  { %v275_v30 = vsub.f32 %v266_v16, %v273_v29 }
 0x29e   :  { %v278_v31 = vmul.f32 1.442695, %v275_v30 }
 0x2a0   :  { %2349 = vpow2.f32 %v278_v31 }
 0x2a2   :  { %559 = vrot.lane.b32.xlu1 %v185_v2, %s2439_s3 }
 0x2a6   :  { %v2350_v32 = vpop.eup %2349 }
 0x2a7   :  { %v283_v33 = vsel %vm215_vm8, %v2350_v32, 0.0 }
 0x2a8   :  { %284 = vadd.xlane.f32.xlu2 %v283_v33 }
 0x2aa   :  { %694 = vrot.lane.b32.xlu1 %v2615_v62, %s2440_s23 }
 0x2ae   :  { %v417_v34 = vpop.permute.xlu0 %416  ;;  %692 = vrot.lane.b32.xlu0 %v2617_v63, %s2440_s23 }
 0x2af   :  { %437 = vmatpush.msra.mxu3 %v417_v34 }
 0x2b2   :  { %557 = vrot.lane.b32.xlu1 %v160_v3, %s2439_s3 }
 0x2b6   :  { %722 = vrot.lane.b32.xlu0 %v185_v2, %s2440_s23 }
 0x2be   :  { %720 = vrot.lane.b32.xlu0 %v160_v3, %s2440_s23 }
 0x2ec   :  { %v395_v35 = vpop.xlane.xlu1 %394 }
 0x2ed   :  { %v399_v36 = vsub.f32 %v363_v19, %v395_v35 }
 0x2ef   :  { %v401_v37 = vmul.f32 1.442695, %v399_v36 }
 0x2f1   :  { %2351 = vpow2.f32 %v401_v37 }
 0x2f7   :  { %v2352_v38 = vpop.eup %2351 }
 0x2f8   :  { %v405_v39 = vsel %vm215_vm8, %v2352_v38, 0.0 }
 0x2f9   :  { %406 = vadd.xlane.f32.xlu2 %v405_v39 }
 0x304   :  { %v530_v41 = vpop.permute.xlu1 %529 }
 0x30c   :  { %v282_v42 = vpop.xlane.xlu2 %281  ;;  %v444_v43 = vpop.permute.xlu1 %443 }
 0x30d   :  { %2353 = vrcp.f32 %v282_v42  ;;  %464 = vmatpush.msrb.mxu0 %v444_v43  ;;  %v398_v51 = vpop.xlane.xlu0 %397  ;;  %v2220_v43 = vld [vmem:[%s3175_s7 + $0x10] sm:$0xff] }
 0x30e   :  { %v400_v52 = vsub.f32 %v391_v26, %v398_v51  ;;  %682 = vmatpush.msrb.mxu1 %v2220_v43  ;;  %v2766_v43 = vld [vmem:[%s3177_s9] ss:$0 sm:$0xff] }
 0x310   :  { %v403_v53 = vmul.f32 1.442695, %v400_v52 }
 0x311   :  { %531 = vrot.lane.b32.xlu2 %v2615_v62, %s2439_s3 }
 0x313   :  { %v2354_v44 = vpop.eup %2353 }
 0x314   :  { %v560_v45 = vpop.permute.xlu1 %559  ;;  %v288_v46 = vmul.f32 %v2354_v44, %v2348_v25 }
 0x316   :  { %2201 = vmatmul.msk.f32.vlgmr.msrb.gmra.mxu3 %vm215_vm8, %v288_v46 }
 0x31b   :  { %v285_v47 = vpop.xlane.xlu2 %284 }
 0x31c   :  { %2355 = vrcp.f32 %v285_v47  ;;  %v695_v48 = vpop.permute.xlu1 %694 }
 0x31d   :  { %2223 = vmatpush.xpose.msk.msrb.mxu2 %vm215_vm8, %v695_v48  ;;  %2357 = vpow2.f32 %v403_v53 }
 0x320   :  { %v693_v1 = vpop.permute.xlu0 %692 }
 0x322   :  { %v2356_v49 = vpop.eup %2355 }
 0x323   :  { %v289_v50 = vmul.f32 %v2356_v49, %v2350_v32  ;;  %v2358_v54 = vpop.eup %2357 }
 0x324   :  { %v408_v56 = vsel %vm215_vm8, %v2358_v54, 0.0  ;;  %v558_v6 = vpop.permute.xlu1 %557 }
 0x325   :  { %2202 = vmatmul.msk.f32.vlgmr.msra.gmra.mxu0 %vm215_vm8, %v289_v50 }
 0x326   :  { %2216 = vmatpush.xpose.msk.msra.mxu0 %vm215_vm8, %v560_v45 }
 0x328   :  { %v723_v24 = vpop.permute.xlu0 %722 }
 0x330   :  { %v721_v26 = vpop.permute.xlu0 %720 }
 0x33a   :  { %409 = vadd.xlane.f32.xlu2 %v408_v56 }
 0x36c   :  { %v407_v57 = vpop.xlane.xlu2 %406 }
 0x36d   :  { %2359 = vrcp.f32 %v407_v57 }
 0x373   :  { %v2360_v58 = vpop.eup %2359 }
 0x374   :  { %v413_v59 = vmul.f32 %v2360_v58, %v2352_v38  ;;  %v532_v61 = vpop.permute.xlu2 %531 }
 0x375   :  { %2214 = vmatpush.xpose.msk.msrb.mxu3 %vm215_vm8, %v532_v61 }
 0x376   :  { %2207 = vmatmul.msk.f32.vlgmr.msra.gmra.mxu3 %vm215_vm8, %v413_v59 }
 0x37e   :  { %2215 = vmatmul.msk.f32.vlgmr.msrb.gmra.mxu3 %vm215_vm8, %v530_v41 }
 0x399   :  { %v310_v62 = vpop.f32.mrf.mxu3 }
 0x39a   :  { %2212 = vmatmul.msk.f32.vlgmr.msra.gmra.mxu2 %vm215_vm8, %v310_v62  ;;  %v2229_v62 = vld [vmem:[%s3175_s7 + $0x18] sm:$0xff] }
 0x3a2   :  { %v333_v63 = vpop.f32.mrf.mxu0 }
 0x3a3   :  { %2213 = vmatmul.msk.f32.gmra.mxu2 %vm215_vm8, %v333_v63 }
 0x3ab   :  { %2224 = vmatmul.msk.f32.vlgmr.msrb.gmra.mxu2 %vm215_vm8, %v693_v1 }
 0x3ad   :  { %v410_v2 = vpop.xlane.xlu2 %409 }
 0x3ae   :  { %2361 = vrcp.f32 %v410_v2 }
 0x3b4   :  { %v2362_v3 = vpop.eup %2361 }
 0x3b5   :  { %v414_v5 = vmul.f32 %v2362_v3, %v2358_v54 }
 0x3b7   :  { %2208 = vmatmul.msk.f32.vlgmr.msrb.gmra.mxu0 %vm215_vm8, %v414_v5 }
 0x3bf   :  { %2217 = vmatmul.msk.f32.vlgmr.msra.gmra.mxu0 %vm215_vm8, %v558_v6 }
 0x3f9   :  { %v439_v8 = vpop.f32.mrf.mxu3 }
 0x3fa   :  { %2210 = vmatmul.msk.f32.vlgmr.msra.gmra.mxu1 %vm215_vm8, %v439_v8 }
 0x401   :  { %v554_v11 = vpop.f32.mrf.mxu3 }
 0x402   :  { %v555_v12 = vadd.f32 %v554_v11, %v2644_v9 }
 0x404   :  { %v585_v13 = vsel %vm215_vm8, %v555_v12, -inf }
 0x405   :  { %586 = vmax.xlane.f32.xlu1 %v585_v13  ;;  %v2327_v13 = vld [vmem:[%s3176_s8] ss:$0 sm:$0xff] }
 0x41d   :  { %v2708_v25 = vpop.f32.mrf.mxu2 }
 0x426   :  { %v2710_v28 = vpop.f32.mrf.mxu2 }
 0x42e   :  { %v717_v32 = vpop.f32.mrf.mxu2 }
 0x42f   :  { %v718_v34 = vadd.f32 %v717_v32, %v2644_v9 }
 0x431   :  { %v748_v35 = vsel %vm215_vm8, %v718_v34, -inf }
 0x434   :  { %v466_v15 = vpop.f32.mrf.mxu0 }
 0x435   :  { %2211 = vmatmul.msk.f32.gmra.mxu1 %vm215_vm8, %v466_v15 }
 0x43c   :  { %v582_v16 = vpop.f32.mrf.mxu0 }
 0x43d   :  { %v583_v17 = vadd.f32 %v582_v16, %v2651_v14 }
 0x43f   :  { %v588_v18 = vsel %vm215_vm8, %v583_v17, -inf }
 0x440   :  { %589 = vmax.xlane.f32.xlu0 %v588_v18 }
 0x454   :  { %770 = vrot.lane.b32.xlu0 %v2625_v0, %s2440_s23 }
 0x477   :  { %v494_v6 = vpop.f32.mrf.mxu1 }
 0x478   :  { %v587_v19 = vpop.xlane.xlu1 %586  ;;  %v524_v11 = vadd.f32 %v2708_v25, %v494_v6 }
 0x479   :  { %v591_v20 = vsub.f32 %v555_v12, %v587_v19 }
 0x47b   :  { %v593_v21 = vmul.f32 1.442695, %v591_v20 }
 0x47d   :  { %2363 = vpow2.f32 %v593_v21 }
 0x483   :  { %v2364_v22 = vpop.eup %2363 }
 0x484   :  { %v597_v23 = vsel %vm215_vm8, %v2364_v22, 0.0 }
 0x485   :  { %598 = vadd.xlane.f32.xlu2 %v597_v23 }
 0x49d   :  { %607 = vrot.lane.b32.xlu2 %v2625_v0, %s2439_s3 }
 0x4b2   :  { %v497_v7 = vpop.f32.mrf.mxu1 }
 0x4b3   :  { %v590_v27 = vpop.xlane.xlu0 %589 }
 0x4b4   :  { %v592_v29 = vsub.f32 %v583_v17, %v590_v27  ;;  %v527_v27 = vadd.f32 %v2710_v28, %v497_v7  ;;  %v920_v28 = vld [vmem:[%s3180_s11 + $0x8] sm:$0xff]  ;;  %v1048_v7 = vld [vmem:[%s3182_s13 + $0x20] sm:$0xff] }
 0x4b6   :  { %v595_v30 = vmul.f32 1.442695, %v592_v29 }
 0x4b8   :  { %2365 = vpow2.f32 %v595_v30 }
 0x4be   :  { %v2366_v31 = vpop.eup %2365 }
 0x4bf   :  { %v600_v33 = vsel %vm215_vm8, %v2366_v31, 0.0 }
 0x4c0   :  { %601 = vadd.xlane.f32.xlu1 %v600_v33 }
 0x4c6   :  { %749 = vmax.xlane.f32.xlu2 %v748_v35  ;;  %v771_v53 = vpop.permute.xlu0 %770  ;;  %v921_v35 = vld [vmem:[%s3180_s11 + $0x10] sm:$0xff] }
 0x4f8   :  { %v599_v0 = vpop.xlane.xlu2 %598 }
 0x4f9   :  { %2367 = vrcp.f32 %v599_v0 }
 0x4ff   :  { %v2368_v36 = vpop.eup %2367 }
 0x500   :  { %v605_v37 = vmul.f32 %v2368_v36, %v2364_v22  ;;  %v608_v38 = vpop.permute.xlu2 %607 }
 0x501   :  { %628 = vmatpush.msra.mxu3 %v608_v38 }
 0x502   :  { %2218 = vmatmul.msk.f32.vlgmr.msra.gmra.mxu3 %vm215_vm8, %v605_v37 }
 0x503   :  { %2225 = vmatpush.xpose.msk.msrb.mxu3 %vm215_vm8, %v723_v24 }
 0x507   :  { %845 = vmatpush.msra.mxu3 %v2229_v62 }
 0x50a   :  { %2226 = vmatmul.msk.f32.vlgmr.msrb.gmra.mxu3 %vm215_vm8, %v721_v26 }
 0x533   :  { %v602_v48 = vpop.xlane.xlu1 %601 }
 0x539   :  { %v750_v39 = vpop.xlane.xlu2 %749 }
 0x53a   :  { %v754_v40 = vsub.f32 %v718_v34, %v750_v39  ;;  %v922_v34 = vld [vmem:[%s3180_s11 + $0x18] sm:$0xff] }
 0x53c   :  { %v756_v41 = vmul.f32 1.442695, %v754_v40 }
 0x53e   :  { %2369 = vpow2.f32 %v756_v41 }
 0x53f   :  { %2371 = vrcp.f32 %v602_v48 }
 0x544   :  { %v2370_v9 = vpop.eup %2369 }
 0x545   :  { %v760_v42 = vsel %vm215_vm8, %v2370_v9, 0.0  ;;  %v2372_v50 = vpop.eup %2371 }
 0x546   :  { %761 = vadd.xlane.f32.xlu1 %v760_v42  ;;  %v606_v51 = vmul.f32 %v2372_v50, %v2366_v31 }
 0x55f   :  { %633 = vrot.lane.b32.xlu1 %v2634_v4, %s2439_s3 }
 0x585   :  { %v630_v44 = vpop.f32.mrf.mxu3 }
 0x586   :  { %2221 = vmatmul.msk.f32.vlgmr.msrb.gmra.mxu1 %vm215_vm8, %v630_v44 }
 0x58d   :  { %v745_v45 = vpop.f32.mrf.mxu3 }
 0x58e   :  { %v746_v46 = vadd.f32 %v745_v45, %v2651_v14 }
 0x590   :  { %v751_v47 = vsel %vm215_vm8, %v746_v46, -inf }
 0x591   :  { %752 = vmax.xlane.f32.xlu2 %v751_v47 }
 0x5a9   :  { %796 = vrot.lane.b32.xlu2 %v2634_v4, %s2440_s23 }
 0x5b9   :  { %v762_v49 = vpop.xlane.xlu1 %761 }
 0x5ba   :  { %2373 = vrcp.f32 %v762_v49 }
 0x5c0   :  { %v2374_v54 = vpop.eup %2373 }
 0x5c1   :  { %v768_v14 = vmul.f32 %v2374_v54, %v2370_v9  ;;  %v2788_v54 = vld [vmem:[%s3179_s12] ss:$0 sm:$0xff] }
 0x5d1   :  { %v634_v52 = vpop.permute.xlu1 %633 }
 0x5d2   :  { %654 = vmatpush.msrb.mxu0 %v634_v52 }
 0x5d3   :  { %2219 = vmatmul.msk.f32.vlgmr.msrb.gmra.mxu0 %vm215_vm8, %v606_v51 }
 0x5d4   :  { %791 = vmatpush.msra.mxu0 %v771_v53 }
 0x5d6   :  { %945 = vmatpush.msrb.mxu0 %v922_v34 }
 0x5d8   :  { %946 = vmatpush.msrb.mxu0 %v921_v35 }
 0x5da   :  { %947 = vmatpush.msrb.mxu0 %v920_v28 }
 0x5db   :  { %2227 = vmatmul.msk.f32.vlgmr.msra.gmra.mxu0 %vm215_vm8, %v768_v14 }
 0x603   :  { %v684_v8 = vpop.f32.mrf.mxu1 }
 0x604   :  { %v753_v56 = vpop.xlane.xlu2 %752  ;;  %v690_v12 = vadd.f32 %v684_v8, %v524_v11 }
 0x605   :  { %v755_v57 = vsub.f32 %v746_v46, %v753_v56  ;;  %v2771_v46 = vld [vmem:[%s3178_s10] ss:$0 sm:$0xff] }
 0x607   :  { %v758_v58 = vmul.f32 1.442695, %v755_v57 }
 0x609   :  { %2375 = vpow2.f32 %v758_v58 }
 0x60c   :  { %v797_v4 = vpop.permute.xlu2 %796 }
 0x60d   :  { %817 = vmatpush.msra.mxu2 %v797_v4 }
 0x60f   :  { %v2376_v59 = vpop.eup %2375 }
 0x610   :  { %v763_v61 = vsel %vm215_vm8, %v2376_v59, 0.0 }
 0x611   :  { %764 = vadd.xlane.f32.xlu1 %v763_v61 }
 0x650   :  { %v656_v63 = vpop.f32.mrf.mxu0 }
 0x651   :  { %2222 = vmatmul.msk.f32.gmra.mxu1 %vm215_vm8, %v656_v63  ;;  %v1050_v63 = vld [vmem:[%s3182_s13 + $0x30] sm:$0xff] }
 0x658   :  { %v793_v1 = vpop.f32.mrf.mxu0 }
 0x659   :  { %2230 = vmatmul.msk.f32.vlgmr.msra.gmra.mxu3 %vm215_vm8, %v793_v1 }
 0x684   :  { %v765_v2 = vpop.xlane.xlu1 %764 }
 0x685   :  { %2377 = vrcp.f32 %v765_v2 }
 0x68b   :  { %v2378_v3 = vpop.eup %2377 }
 0x68c   :  { %v769_v5 = vmul.f32 %v2378_v3, %v2376_v59  ;;  %v1051_v59 = vld [vmem:[%s3182_s13 + $0x38] sm:$0xff]  ;;  %v1049_v3 = vld [vmem:[%s3182_s13 + $0x28] sm:$0xff] }
 0x68d   :  { %1071 = vmatpush.msra.mxu1 %v1051_v59 }
 0x68e   :  { %2228 = vmatmul.msk.f32.vlgmr.msra.gmra.mxu2 %vm215_vm8, %v769_v5 }
 0x68f   :  { %1072 = vmatpush.msra.mxu1 %v1050_v63 }
 0x691   :  { %1073 = vmatpush.msra.mxu1 %v1049_v3 }
 0x693   :  { %1074 = vmatpush.msra.mxu1 %v1048_v7 }
 0x6ce   :  { %v687_v26 = vpop.f32.mrf.mxu1 }
 0x6cf   :  { %v691_v29 = vadd.f32 %v687_v26, %v527_v27 }
 0x6dc   :  { %v847_v15 = vpop.f32.mrf.mxu3 }
 0x6dd   :  { %v853_v16 = vadd.f32 %v847_v15, %v690_v12  ;;  %v1047_v12 = vld [vmem:[%s3182_s13 + $0x18] sm:$0xff]  ;;  %v1046_v15 = vld [vmem:[%s3182_s13 + $0x10] sm:$0xff] }
 0x6de   :  { %1075 = vmatpush.msra.mxu1 %v1047_v12 }
 0x6df   :  { %v859_v17 = vadd.f32 %v2327_v13, %v853_v16 }
 0x6e0   :  { %1076 = vmatpush.msra.mxu1 %v1046_v15 }
 0x6e1   :  { %v861_v18 = vadd.f32 %v859_v17, %v2598_v55 }
 0x6e3   :  { %v865_v19 = vsel %vm64_vm0, %v861_v18, 0.0 }
 0x6e4   :  { %866 = vadd.xlane.f32.xlu0 %v865_v19 }
 0x711   :  { %v819_v20 = vpop.f32.mrf.mxu2 }
 0x712   :  { %2231 = vmatmul.msk.f32.gmra.mxu3 %vm215_vm8, %v819_v20  ;;  %v1044_v20 = vld [vmem:[%s3182_s13] sm:$0xff] }
 0x757   :  { %v867_v21 = vpop.xlane.xlu0 %866 }
 0x758   :  { %v871_v22 = vmul.f32 %v867_v21, %v2544_v10 }
 0x75a   :  { %v873_v23 = vsub.f32 %v861_v18, %v871_v22  ;;  %v1045_v18 = vld [vmem:[%s3182_s13 + $0x8] sm:$0xff] }
 0x75b   :  { %1077 = vmatpush.msra.mxu1 %v1045_v18 }
 0x75c   :  { %v875_v24 = vmul.f32 %v873_v23, %v873_v23 }
 0x75d   :  { %1078 = vmatpush.msra.mxu1 %v1044_v20 }
 0x75e   :  { %v877_v25 = vsel %vm64_vm0, %v875_v24, 0.0 }
 0x75f   :  { %878 = vadd.xlane.f32.xlu2 %v877_v25 }
 0x795   :  { %v850_v30 = vpop.f32.mrf.mxu3 }
 0x796   :  { %v854_v55 = vadd.f32 %v850_v30, %v691_v29 }
 0x798   :  { %v860_v31 = vadd.f32 %v2327_v13, %v854_v55 }
 0x79a   :  { %v862_v32 = vadd.f32 %v860_v31, %v2607_v60  ;;  %v919_v60 = vld [vmem:[%s3180_s11] sm:$0xff] }
 0x79b   :  { %948 = vmatpush.msrb.mxu0 %v919_v60 }
 0x79c   :  { %v868_v33 = vsel %vm64_vm0, %v862_v32, 0.0 }
 0x79d   :  { %869 = vadd.xlane.f32.xlu1 %v868_v33 }
 0x7d2   :  { %v879_v0 = vpop.xlane.xlu2 %878 }
 0x7d3   :  { %v883_v36 = vmul.f32 %v879_v0, %v2544_v10 }
 0x7d5   :  { %v885_v37 = vadd.f32 1e-12, %v883_v36 }
 0x7d7   :  { %2379 = vrsqrt.f32 %v885_v37  ;;  %vm893_vm10 = vweird.f32 %v885_v37 }
 0x7dd   :  { %v2380_v38 = vpop.eup %2379 }
 0x7de   :  { %v888_v39 = vmul.f32 %v2380_v38, %v885_v37  ;;  %vm894_vm9 = vweird.f32 %v2380_v38 }
 0x7df   :  { %vm895_vm11 = vmor %vm893_vm10, %vm894_vm9 }
 0x7e0   :  { %v889_v40 = vmul.f32 %v2380_v38, %v888_v39 }
 0x7e2   :  { %v890_v41 = vmul.f32 0.5, %v889_v40 }
 0x7e4   :  { %v891_v9 = vsub.f32 1.5, %v890_v41 }
 0x7e6   :  { %v892_v42 = vmul.f32 %v2380_v38, %v891_v9 }
 0x7e8   :  { %v896_v44 = vsel %vm895_vm11, %v2380_v38, %v892_v42 }
 0x7e9   :  { %v907_v45 = vmul.f32 %v896_v44, %v873_v23 }
 0x7eb   :  { %v912_v47 = vmul.f32 %v2766_v43, %v907_v45 }
 0x7ed   :  { %v2775_v48 = vadd.f32 %v2771_v46, %v912_v47 }
 0x7ef   :  { %2232 = vmatmul.msk.f32.vlgmr.msrb.gmra.mxu0 %vm64_vm0, %v2775_v48 }
 0x810   :  { %v870_v49 = vpop.xlane.xlu1 %869 }
 0x811   :  { %v872_v50 = vmul.f32 %v870_v49, %v2544_v10 }
 0x813   :  { %v2780_v51 = vsub.f32 %v862_v32, %v872_v50 }
 0x815   :  { %v876_v52 = vmul.f32 %v2780_v51, %v2780_v51 }
 0x817   :  { %v880_v53 = vsel %vm64_vm0, %v876_v52, 0.0 }
 0x818   :  { %881 = vadd.xlane.f32.xlu1 %v880_v53 }
 0x86c   :  { %v950_v14 = vpop.f32.mrf.mxu0 }
 0x86d   :  { %v2791_v56 = vadd.f32 %v2788_v54, %v950_v14 }
 0x86f   :  { %v958_v57 = vmul.f32 0.70710677, %v2791_v56  ;;  %v956_v49 = vmul.f32 0.5, %v2791_v56  ;;  %v2831_v56 = vld [vmem:[%s3181_s14] ss:$0 sm:$0xff] }
 0x871   :  { %v960_v58 = vmul.f32 %v958_v57, %v958_v57 }
 0x873   :  { %v961_v4 = vmin.f32 %v960_v58, 16.0 }
 0x875   :  { %v962_v61 = vmul.f32 2.1237322e-06, %v961_v4  ;;  %v973_v62 = vmul.f32 3.8918573e-05, %v961_v4 }
 0x877   :  { %v963_v1 = vadd.f32 0.00028619796, %v962_v61  ;;  %v974_v2 = vadd.f32 0.001143296, %v973_v62 }
 0x879   :  { %v964_v5 = vmul.f32 %v963_v1, %v961_v4  ;;  %v975_v6 = vmul.f32 %v974_v2, %v961_v4 }
 0x87b   :  { %v976_v8 = vadd.f32 0.014752088, %v975_v6  ;;  %v965_v11 = vadd.f32 0.0036580483, %v964_v5 }
 0x87d   :  { %v977_v13 = vmul.f32 %v976_v8, %v961_v4  ;;  %v966_v17 = vmul.f32 %v965_v11, %v961_v4 }
 0x87f   :  { %v978_v16 = vadd.f32 0.112945676, %v977_v13  ;;  %v967_v22 = vadd.f32 0.05243302, %v966_v17 }
 0x881   :  { %v979_v19 = vmul.f32 %v978_v16, %v961_v4  ;;  %v968_v25 = vmul.f32 %v967_v22, %v961_v4 }
 0x883   :  { %v980_v21 = vadd.f32 0.4994258, %v979_v19  ;;  %v969_v27 = vadd.f32 0.18741608, %v968_v25 }
 0x885   :  { %v981_v23 = vmul.f32 %v980_v21, %v961_v4  ;;  %v970_v31 = vmul.f32 %v969_v27, %v961_v4 }
 0x887   :  { %v982_v24 = vadd.f32 1.0, %v981_v23  ;;  %v971_v35 = vadd.f32 1.1283791, %v970_v31 }
 0x889   :  { %2381 = vrcp.f32 %v982_v24  ;;  %v994_v34 = vand.u32 2147483648, %v982_v24  ;;  %v992_v60 = vand.u32 2147483647, %v982_v24  ;;  %vm988_vm13 = vweird.f32 %v982_v24 }
 0x88a   :  { %v972_v39 = vmul.f32 %v971_v35, %v958_v57 }
 0x88b   :  { %v882_v26 = vpop.xlane.xlu1 %881  ;;  %v995_v37 = vor.u32 1.1754944e-38, %v994_v34  ;;  %vm993_vm15 = vcmp.eq.f32.partialorder %v992_v60, 8.507059e+37 }
 0x88c   :  { %v884_v29 = vmul.f32 %v882_v26, %v2544_v10 }
 0x88e   :  { %v886_v30 = vadd.f32 1e-12, %v884_v29 }
 0x88f   :  { %v2382_v55 = vpop.eup %2381 }
 0x890   :  { %v984_v32 = vmul.f32 %v2382_v55, %v982_v24  ;;  %2383 = vrsqrt.f32 %v886_v30  ;;  %vm989_vm12 = vweird.f32 %v2382_v55  ;;  %vm903_vm2 = vweird.f32 %v886_v30 }
 0x891   :  { %vm990_vm14 = vmor %vm988_vm13, %vm989_vm12 }
 0x892   :  { %v985_v33 = vsub.f32 1.0, %v984_v32 }
 0x894   :  { %v986_v28 = vmul.f32 %v2382_v55, %v985_v33 }
 0x896   :  { %v2384_v0 = vpop.eup %2383  ;;  %v987_v36 = vadd.f32 %v2382_v55, %v986_v28 }
 0x897   :  { %v898_v38 = vmul.f32 %v2384_v0, %v886_v30  ;;  %vm904_vm1 = vweird.f32 %v2384_v0 }
 0x898   :  { %v991_v40 = vsel %vm990_vm14, %v2382_v55, %v987_v36  ;;  %vm905_vm4 = vmor %vm903_vm2, %vm904_vm1 }
 0x899   :  { %v996_v41 = vsel %vm993_vm15, %v995_v37, %v991_v40  ;;  %v899_v9 = vmul.f32 %v2384_v0, %v898_v38 }
 0x89a   :  { %v997_v42 = vmul.f32 %v996_v41, %v972_v39 }
 0x89b   :  { %v900_v44 = vmul.f32 0.5, %v899_v9 }
 0x89c   :  { %v2234_v45 = vclamps-f32 %v997_v42, 1.0 }
 0x89d   :  { %v901_v47 = vsub.f32 1.5, %v900_v44 }
 0x89e   :  { %v1040_v50 = vadd.f32 1.0, %v2234_v45 }
 0x89f   :  { %v902_v52 = vmul.f32 %v2384_v0, %v901_v47 }
 0x8a0   :  { %v1042_v53 = vmul.f32 %v1040_v50, %v956_v49  ;;  %v2241_v49 = vld [vmem:[%s3171_s4 + $0x38] sm:$0xff] }
 0x8a1   :  { %v906_v14 = vsel %vm905_vm4, %v2384_v0, %v902_v52  ;;  %v2247_v50 = vld [vmem:[%s3172_s5 + $0x38] sm:$0xff]  ;;  %1171 = vmatpush.msrb.mxu2 %v2241_v49 }
 0x8a2   :  { %2236 = vmatmul.msk.f32.vlgmr.msra.gmra.mxu1 %vm1056_vm3, %v1042_v53  ;;  %v908_v57 = vmul.f32 %v906_v14, %v2780_v51  ;;  %v2253_v52 = vld [vmem:[%s3173_s6 + $0x38] sm:$0xff]  ;;  %1201 = vmatpush.msrb.mxu3 %v2247_v50  ;;  %v2240_v53 = vld [vmem:[%s3171_s4 + $0x30] sm:$0xff] }
 0x8a3   :  { %1229 = vmatpush.msra.mxu0 %v2253_v52  ;;  %v2246_v14 = vld [vmem:[%s3172_s5 + $0x30] sm:$0xff]  ;;  %1172 = vmatpush.msrb.mxu2 %v2240_v53 }
 0x8a4   :  { %v913_v58 = vmul.f32 %v2766_v43, %v908_v57  ;;  %v2252_v57 = vld [vmem:[%s3173_s6 + $0x30] sm:$0xff]  ;;  %1202 = vmatpush.msrb.mxu3 %v2246_v14 }
 0x8a5   :  { %1230 = vmatpush.msra.mxu0 %v2252_v57  ;;  %v2974_v57 = vld [vmem:[%s3174_s1 + $0x8] sm:$0xff] }
 0x8a6   :  { %v2824_v4 = vadd.f32 %v2771_v46, %v913_v58  ;;  %v2239_v58 = vld [vmem:[%s3171_s4 + $0x28] sm:$0xff] }
 0x8a7   :  { %1173 = vmatpush.msrb.mxu2 %v2239_v58 }
 0x8a8   :  { %2233 = vmatmul.msk.f32.gmra.mxu0 %vm64_vm0, %v2824_v4 }
 0x91f   :  { %v1080_v59 = vpop.f32.mrf.mxu1 }
 0x920   :  { %v1081_v61 = vadd.f32 %v2831_v56, %v1080_v59  ;;  %v2238_v59 = vld [vmem:[%s3171_s4 + $0x20] sm:$0xff] }
 0x921   :  { %1174 = vmatpush.msrb.mxu2 %v2238_v59 }
 0x922   :  { %1146 = vst.msk [vmem:[%s3183_s18] sm:$0xff] %vm64_vm0, %v1081_v61  ;;  %v1086_v43 = vadd.f32 %v1081_v61, %v2775_v48  ;;  %v2244_v61 = vld [vmem:[%s3172_s5 + $0x20] sm:$0xff] }
 0x924   :  { %v1090_v46 = vsel %vm64_vm0, %v1086_v43, 0.0 }
 0x925   :  { %1091 = vadd.xlane.f32.xlu0 %v1090_v46  ;;  %v953_v51 = vpop.f32.mrf.mxu0 }
 0x926   :  { %v954_v62 = vadd.f32 %v2788_v54, %v953_v51 }
 0x928   :  { %v959_v63 = vmul.f32 0.70710677, %v954_v62  ;;  %v957_v0 = vmul.f32 0.5, %v954_v62 }
 0x92a   :  { %v1000_v1 = vmul.f32 %v959_v63, %v959_v63 }
 0x92c   :  { %v1001_v2 = vmin.f32 %v1000_v1, 16.0 }
 0x92e   :  { %v1002_v3 = vmul.f32 2.1237322e-06, %v1001_v2  ;;  %v1013_v5 = vmul.f32 3.8918573e-05, %v1001_v2 }
 0x930   :  { %v1003_v6 = vadd.f32 0.00028619796, %v1002_v3  ;;  %v1014_v7 = vadd.f32 0.001143296, %v1013_v5 }
 0x932   :  { %v1004_v8 = vmul.f32 %v1003_v6, %v1001_v2  ;;  %v1015_v11 = vmul.f32 %v1014_v7, %v1001_v2  ;;  %v2332_v7 = vld [vmem:[%s3184_s15] ss:$0 sm:$0xff] }
 0x934   :  { %v1016_v12 = vadd.f32 0.014752088, %v1015_v11  ;;  %v1005_v13 = vadd.f32 0.0036580483, %v1004_v8 }
 0x936   :  { %v1017_v15 = vmul.f32 %v1016_v12, %v1001_v2  ;;  %v1006_v48 = vmul.f32 %v1005_v13, %v1001_v2  ;;  %v2333_v12 = vld [vmem:[%s3185_s16] ss:$0 sm:$0xff] }
 0x938   :  { %v1018_v16 = vadd.f32 0.112945676, %v1017_v15  ;;  %v1007_v19 = vadd.f32 0.05243302, %v1006_v48 }
 0x93a   :  { %v1019_v17 = vmul.f32 %v1018_v16, %v1001_v2  ;;  %v1008_v54 = vmul.f32 %v1007_v19, %v1001_v2 }
 0x93c   :  { %v1020_v18 = vadd.f32 0.4994258, %v1019_v17  ;;  %v1009_v22 = vadd.f32 0.18741608, %v1008_v54 }
 0x93e   :  { %v1021_v20 = vmul.f32 %v1020_v18, %v1001_v2  ;;  %v1010_v24 = vmul.f32 %v1009_v22, %v1001_v2 }
 0x940   :  { %v1022_v21 = vadd.f32 1.0, %v1021_v20  ;;  %v1011_v29 = vadd.f32 1.1283791, %v1010_v24 }
 0x942   :  { %2385 = vrcp.f32 %v1022_v21  ;;  %v1034_v27 = vand.u32 2147483648, %v1022_v21  ;;  %v1032_v55 = vand.u32 2147483647, %v1022_v21  ;;  %vm1028_vm6 = vweird.f32 %v1022_v21 }
 0x943   :  { %v1012_v33 = vmul.f32 %v1011_v29, %v959_v63 }
 0x944   :  { %v1035_v32 = vor.u32 1.1754944e-38, %v1034_v27  ;;  %vm1033_vm9 = vcmp.eq.f32.partialorder %v1032_v55, 8.507059e+37 }
 0x948   :  { %v2386_v23 = vpop.eup %2385 }
 0x949   :  { %v1024_v25 = vmul.f32 %v2386_v23, %v1022_v21  ;;  %vm1029_vm5 = vweird.f32 %v2386_v23 }
 0x94a   :  { %vm1030_vm7 = vmor %vm1028_vm6, %vm1029_vm5 }
 0x94b   :  { %v1025_v26 = vsub.f32 1.0, %v1024_v25 }
 0x94d   :  { %v1026_v30 = vmul.f32 %v2386_v23, %v1025_v26 }
 0x94f   :  { %v1027_v31 = vadd.f32 %v2386_v23, %v1026_v30 }
 0x951   :  { %v1031_v34 = vsel %vm1030_vm7, %v2386_v23, %v1027_v31 }
 0x952   :  { %v1036_v35 = vsel %vm1033_vm9, %v1035_v32, %v1031_v34 }
 0x953   :  { %v1037_v28 = vmul.f32 %v1036_v35, %v1012_v33 }
 0x955   :  { %v2235_v60 = vclamps-f32 %v1037_v28, 1.0 }
 0x957   :  { %v1041_v36 = vadd.f32 1.0, %v2235_v60 }
 0x959   :  { %v1043_v37 = vmul.f32 %v1041_v36, %v957_v0  ;;  %v2943_v36 = vld [vmem:[%s3174_s1] sm:$0xff] }
 0x95b   :  { %2237 = vmatmul.msk.f32.gmra.mxu1 %vm1056_vm3, %v1043_v37 }
 0x998   :  { %v1092_v38 = vpop.xlane.xlu0 %1091 }
 0x999   :  { %v1096_v39 = vmul.f32 %v1092_v38, %v2544_v10 }
 0x99b   :  { %v1098_v40 = vsub.f32 %v1086_v43, %v1096_v39  ;;  %v2250_v43 = vld [vmem:[%s3173_s6 + $0x20] sm:$0xff] }
 0x99d   :  { %v1100_v41 = vmul.f32 %v1098_v40, %v1098_v40 }
 0x99f   :  { %v1102_v9 = vsel %vm64_vm0, %v1100_v41, 0.0 }
 0x9a0   :  { %1103 = vadd.xlane.f32.xlu1 %v1102_v9 }
 0x9d8   :  { %v1083_v42 = vpop.f32.mrf.mxu1 }
 0x9d9   :  { %v1084_v44 = vadd.f32 %v2831_v56, %v1083_v42  ;;  %v2251_v56 = vld [vmem:[%s3173_s6 + $0x28] sm:$0xff] }
 0x9da   :  { %1231 = vmatpush.msra.mxu0 %v2251_v56 }
 0x9db   :  { %1147 = vst.msk [vmem:[%s3183_s18 + $0x8] sm:$0xff] %vm64_vm0, %v1084_v44  ;;  %v1087_v45 = vadd.f32 %v1084_v44, %v2824_v4  ;;  %v2245_v4 = vld [vmem:[%s3172_s5 + $0x28] sm:$0xff] }
 0x9dc   :  { %1203 = vmatpush.msrb.mxu3 %v2245_v4  ;;  %1232 = vmatpush.msra.mxu0 %v2250_v43 }
 0x9dd   :  { %v1093_v47 = vsel %vm64_vm0, %v1087_v45, 0.0 }
 0x9de   :  { %1094 = vadd.xlane.f32.xlu0 %v1093_v47  ;;  %1204 = vmatpush.msrb.mxu3 %v2244_v61 }
 0xa13   :  { %v1104_v46 = vpop.xlane.xlu1 %1103 }
 0xa14   :  { %v1108_v51 = vmul.f32 %v1104_v46, %v2544_v10 }
 0xa16   :  { %v1110_v62 = vadd.f32 1e-12, %v1108_v51 }
 0xa18   :  { %2387 = vrsqrt.f32 %v1110_v62  ;;  %vm1118_vm11 = vweird.f32 %v1110_v62 }
 0xa1e   :  { %v2388_v63 = vpop.eup %2387 }
 0xa1f   :  { %v1113_v1 = vmul.f32 %v2388_v63, %v1110_v62  ;;  %vm1119_vm10 = vweird.f32 %v2388_v63 }
 0xa20   :  { %vm1120_vm12 = vmor %vm1118_vm11, %vm1119_vm10 }
 0xa21   :  { %v1114_v2 = vmul.f32 %v2388_v63, %v1113_v1 }
 0xa23   :  { %v1115_v3 = vmul.f32 0.5, %v1114_v2 }
 0xa25   :  { %v1116_v5 = vsub.f32 1.5, %v1115_v3 }
 0xa27   :  { %v1117_v6 = vmul.f32 %v2388_v63, %v1116_v5 }
 0xa29   :  { %v1121_v8 = vsel %vm1120_vm12, %v2388_v63, %v1117_v6 }
 0xa2a   :  { %v1132_v11 = vmul.f32 %v1121_v8, %v1098_v40 }
 0xa2c   :  { %v1137_v13 = vmul.f32 %v2332_v7, %v1132_v11 }
 0xa2e   :  { %v2894_v15 = vadd.f32 %v2333_v12, %v1137_v13  ;;  %v2262_v13 = vld [vmem:[%s3175_s7 + $0x20] sm:$0xff] }
 0xa30   :  { %2242 = vmatmul.msk.f32.vlgmr.msrb.gmra.mxu2 %vm64_vm0, %v2894_v15  ;;  %2248 = vmatmul.msk.f32.vlgmr.msrb.gmra.mxu3 %vm64_vm0, %v2894_v15  ;;  %1144 = vst.msk [vmem:[%s3186_s17] sm:$0xff] %vm64_vm0, %v2894_v15 }
 0xa31   :  { %2254 = vmatmul.msk.f32.vlgmr.msra.gmra.mxu0 %vm64_vm0, %v2894_v15 }
 0xa51   :  { %v1095_v16 = vpop.xlane.xlu0 %1094 }
 0xa52   :  { %v1097_v48 = vmul.f32 %v1095_v16, %v2544_v10 }
 0xa54   :  { %v1099_v17 = vsub.f32 %v1087_v45, %v1097_v48 }
 0xa56   :  { %v1101_v18 = vmul.f32 %v1099_v17, %v1099_v17 }
 0xa58   :  { %v1105_v19 = vsel %vm64_vm0, %v1101_v18, 0.0 }
 0xa59   :  { %1106 = vadd.xlane.f32.xlu1 %v1105_v19 }
 0xaae   :  { %v2911_v54 = vpop.f32.mrf.mxu0 }
 0xab3   :  { %v1176_v20 = vpop.f32.mrf.mxu2  ;;  %v2909_v21 = vpop.f32.mrf.mxu3 }
 0xab4   :  { %v2913_v22 = vmul.f32 0.17677669, %v1176_v20  ;;  %1364 = vrot.lane.b32.xlu2 %v2909_v21, %s2438_s19  ;;  %2256 = vmatpush.xpose.msk.msrb.mxu1 %vm215_vm8, %v2909_v21 }
 0xab6   :  { %1362 = vrot.lane.b32.xlu0 %v2913_v22, %s2438_s19 }
 0xab7   :  { %2257 = vmatmul.msk.f32.vlgmr.msrb.gmra.mxu1 %vm215_vm8, %v2913_v22 }
 0xab8   :  { %1332 = vmatpush.msra.mxu1 %v2911_v54 }
 0xacc   :  { %v1107_v23 = vpop.xlane.xlu1 %1106 }
 0xacd   :  { %v1109_v24 = vmul.f32 %v1107_v23, %v2544_v10 }
 0xacf   :  { %v1111_v25 = vadd.f32 1e-12, %v1109_v24 }
 0xad1   :  { %2389 = vrsqrt.f32 %v1111_v25  ;;  %vm1128_vm14 = vweird.f32 %v1111_v25 }
 0xad7   :  { %v2390_v26 = vpop.eup %2389 }
 0xad8   :  { %v1123_v27 = vmul.f32 %v2390_v26, %v1111_v25  ;;  %vm1129_vm13 = vweird.f32 %v2390_v26 }
 0xad9   :  { %vm1130_vm15 = vmor %vm1128_vm14, %vm1129_vm13 }
 0xada   :  { %v1124_v29 = vmul.f32 %v2390_v26, %v1123_v27 }
 0xadc   :  { %v1125_v30 = vmul.f32 0.5, %v1124_v29 }
 0xade   :  { %v1126_v55 = vsub.f32 1.5, %v1125_v30  ;;  %v2269_v30 = vld [vmem:[%s3175_s7 + $0x28] sm:$0xff] }
 0xae0   :  { %v1127_v31 = vmul.f32 %v2390_v26, %v1126_v55 }
 0xae2   :  { %v1131_v32 = vsel %vm1130_vm15, %v2390_v26, %v1127_v31 }
 0xae3   :  { %v1133_v33 = vmul.f32 %v1131_v32, %v1099_v17 }
 0xae5   :  { %v1138_v34 = vmul.f32 %v2332_v7, %v1133_v33 }
 0xae7   :  { %v2925_v35 = vadd.f32 %v2333_v12, %v1138_v34 }
 0xae9   :  { %2243 = vmatmul.msk.f32.gmra.mxu2 %vm64_vm0, %v2925_v35  ;;  %2249 = vmatmul.msk.f32.gmra.mxu3 %vm64_vm0, %v2925_v35  ;;  %1145 = vst.msk [vmem:[%s3186_s17 + $0x8] sm:$0xff] %vm64_vm0, %v2925_v35 }
 0xaea   :  { %2255 = vmatmul.msk.f32.gmra.mxu0 %vm64_vm0, %v2925_v35 }
 0xb0e   :  { %v1365_v28 = vpop.permute.xlu2 %1364 }
 0xb0f   :  { %2263 = vmatpush.xpose.msk.msra.mxu3 %vm215_vm8, %v1365_v28 }
 0xb13   :  { %1517 = vmatpush.msrb.mxu3 %v2269_v30 }
 0xb28   :  { %v1363_v60 = vpop.permute.xlu0 %1362 }
 0xb29   :  { %2264 = vmatmul.msk.f32.vlgmr.msra.gmra.mxu3 %vm215_vm8, %v1363_v60 }
 0xb34   :  { %v1263_v0 = vpop.f32.mrf.mxu1 }
 0xb35   :  { %v1264_v37 = vadd.f32 %v2943_v36, %v1263_v0 }
 0xb37   :  { %v1292_v38 = vsel %vm215_vm8, %v1264_v37, -inf }
 0xb38   :  { %1293 = vmax.xlane.f32.xlu1 %v1292_v38 }
 0xb67   :  { %v2949_v41 = vpop.f32.mrf.mxu0 }
 0xb6c   :  { %v1179_v39 = vpop.f32.mrf.mxu2  ;;  %v2947_v40 = vpop.f32.mrf.mxu3 }
 0xb6d   :  { %v2951_v9 = vmul.f32 0.17677669, %v1179_v39  ;;  %2258 = vmatpush.xpose.msk.msra.mxu2 %vm215_vm8, %v2947_v40 }
 0xb6f   :  { %1390 = vrot.lane.b32.xlu0 %v2951_v9, %s2438_s19 }
 0xb70   :  { %2259 = vmatmul.msk.f32.vlgmr.msra.gmra.mxu2 %vm215_vm8, %v2951_v9 }
 0xb71   :  { %1355 = vmatpush.msrb.mxu2 %v2949_v41 }
 0xbab   :  { %v1294_v42 = vpop.xlane.xlu1 %1293 }
 0xbac   :  { %v1298_v44 = vsub.f32 %v1264_v37, %v1294_v42  ;;  %v1387_v45 = vpop.f32.mrf.mxu3 }
 0xbad   :  { %v1388_v47 = vadd.f32 %v2943_v36, %v1387_v45 }
 0xbae   :  { %v1300_v49 = vmul.f32 1.442695, %v1298_v44 }
 0xbaf   :  { %v1418_v50 = vsel %vm215_vm8, %v1388_v47, -inf }
 0xbb0   :  { %2391 = vpow2.f32 %v1300_v49  ;;  %1419 = vmax.xlane.f32.xlu1 %v1418_v50 }
 0xbb6   :  { %v2392_v52 = vpop.eup %2391 }
 0xbb7   :  { %v1304_v53 = vsel %vm215_vm8, %v2392_v52, 0.0 }
 0xbb8   :  { %1305 = vadd.xlane.f32.xlu2 %v1304_v53 }
 0xbc9   :  { %1392 = vrot.lane.b32.xlu1 %v2947_v40, %s2438_s19 }
 0xbd1   :  { %1441 = vrot.lane.b32.xlu1 %v2911_v54, %s2438_s19 }
 0xbd9   :  { %1556 = vrot.lane.b32.xlu1 %v2909_v21, %s2439_s3 }
 0xbe1   :  { %1554 = vrot.lane.b32.xlu1 %v2913_v22, %s2439_s3  ;;  %v1391_v2 = vpop.permute.xlu0 %1390 }
 0xbf3   :  { %v1289_v14 = vpop.f32.mrf.mxu2 }
 0xbf4   :  { %v1290_v58 = vadd.f32 %v2974_v57, %v1289_v14 }
 0xbf6   :  { %v1295_v4 = vsel %vm215_vm8, %v1290_v58, -inf }
 0xbf7   :  { %1296 = vmax.xlane.f32.xlu2 %v1295_v4 }
 0xc23   :  { %v1420_v56 = vpop.xlane.xlu1 %1419 }
 0xc24   :  { %v1424_v59 = vsub.f32 %v1388_v47, %v1420_v56 }
 0xc26   :  { %v1426_v61 = vmul.f32 1.442695, %v1424_v59 }
 0xc28   :  { %2393 = vpow2.f32 %v1426_v61 }
 0xc2b   :  { %v1306_v43 = vpop.xlane.xlu2 %1305 }
 0xc2c   :  { %2395 = vrcp.f32 %v1306_v43 }
 0xc2e   :  { %v2394_v46 = vpop.eup %2393 }
 0xc2f   :  { %v1430_v51 = vsel %vm215_vm8, %v2394_v46, 0.0 }
 0xc30   :  { %1431 = vadd.xlane.f32.xlu0 %v1430_v51 }
 0xc32   :  { %v2396_v62 = vpop.eup %2395 }
 0xc33   :  { %v1312_v63 = vmul.f32 %v2396_v62, %v2392_v52 }
 0xc35   :  { %2260 = vmatmul.msk.f32.vlgmr.msra.gmra.mxu1 %vm215_vm8, %v1312_v63 }
 0xc3b   :  { %v1393_v1 = vpop.permute.xlu1 %1392 }
 0xc3c   :  { %2265 = vmatpush.xpose.msk.msrb.mxu0 %vm215_vm8, %v1393_v1 }
 0xc3f   :  { %2266 = vmatmul.msk.f32.vlgmr.msrb.gmra.mxu0 %vm215_vm8, %v1391_v2 }
 0xc40   :  { %1546 = vmatpush.msra.mxu0 %v2262_v13 }
 0xc43   :  { %v1442_v3 = vpop.permute.xlu1 %1441 }
 0xc44   :  { %1468 = vrot.lane.b32.xlu0 %v2949_v41, %s2438_s19  ;;  %1462 = vmatpush.msrb.mxu1 %v1442_v3 }
 0xc4b   :  { %v1557_v5 = vpop.permute.xlu1 %1556 }
 0xc4c   :  { %2274 = vmatpush.xpose.msk.msra.mxu1 %vm215_vm8, %v1557_v5 }
 0xc53   :  { %v1555_v19 = vpop.permute.xlu1 %1554 }
 0xc6a   :  { %v1297_v6 = vpop.xlane.xlu2 %1296 }
 0xc6b   :  { %v1299_v7 = vsub.f32 %v1290_v58, %v1297_v6 }
 0xc6d   :  { %v1302_v8 = vmul.f32 1.442695, %v1299_v7 }
 0xc6f   :  { %2397 = vpow2.f32 %v1302_v8 }
 0xc75   :  { %v2398_v11 = vpop.eup %2397 }
 0xc76   :  { %v1307_v12 = vsel %vm215_vm8, %v2398_v11, 0.0 }
 0xc77   :  { %1308 = vadd.xlane.f32.xlu1 %v1307_v12 }
 0xc90   :  { %1719 = vrot.lane.b32.xlu1 %v2909_v21, %s2440_s23 }
 0xc98   :  { %1745 = vrot.lane.b32.xlu1 %v2951_v9, %s2440_s23 }
 0xca3   :  { %v1432_v16 = vpop.xlane.xlu0 %1431 }
 0xca4   :  { %2399 = vrcp.f32 %v1432_v16 }
 0xcaa   :  { %v2400_v48 = vpop.eup %2399 }
 0xcab   :  { %v1438_v17 = vmul.f32 %v2400_v48, %v2394_v46 }
 0xcad   :  { %2267 = vmatmul.msk.f32.vlgmr.msrb.gmra.mxu1 %vm215_vm8, %v1438_v17 }
 0xcb2   :  { %v1334_v18 = vpop.f32.mrf.mxu1 }
 0xcb3   :  { %2272 = vmatmul.msk.f32.vlgmr.msra.gmra.mxu0 %vm215_vm8, %v1334_v18 }
 0xcb5   :  { %2275 = vmatmul.msk.f32.vlgmr.msra.gmra.mxu1 %vm215_vm8, %v1555_v19 }
 0xcb6   :  { %v1469_v20 = vpop.permute.xlu0 %1468 }
 0xcb7   :  { %1489 = vmatpush.msra.mxu2 %v1469_v20 }
 0xcbc   :  { %v1415_v21 = vpop.f32.mrf.mxu0 }
 0xcbd   :  { %v1416_v23 = vadd.f32 %v2974_v57, %v1415_v21 }
 0xcbf   :  { %v1421_v24 = vsel %vm215_vm8, %v1416_v23, -inf }
 0xcc0   :  { %1422 = vmax.xlane.f32.xlu2 %v1421_v24 }
 0xcd8   :  { %1584 = vrot.lane.b32.xlu2 %v2947_v40, %s2439_s3 }
 0xcea   :  { %v1309_v25 = vpop.xlane.xlu1 %1308 }
 0xceb   :  { %2401 = vrcp.f32 %v1309_v25 }
 0xcf1   :  { %v2402_v26 = vpop.eup %2401 }
 0xcf2   :  { %v1313_v27 = vmul.f32 %v2402_v26, %v2398_v11 }
 0xcf4   :  { %2261 = vmatmul.msk.f32.vlgmr.msrb.gmra.mxu2 %vm215_vm8, %v1313_v27 }
 0xd02   :  { %v1720_v29 = vpop.permute.xlu1 %1719 }
 0xd03   :  { %2283 = vmatpush.xpose.msk.msrb.mxu0 %vm215_vm8, %v1720_v29 }
 0xd0a   :  { %v1746_v46 = vpop.permute.xlu1 %1745 }
 0xd2a   :  { %v1464_v55 = vpop.f32.mrf.mxu1 }
 0xd2b   :  { %2270 = vmatmul.msk.f32.vlgmr.msrb.gmra.mxu3 %vm215_vm8, %v1464_v55 }
 0xd30   :  { %v3024_v58 = vpop.f32.mrf.mxu0 }
 0xd32   :  { %v1579_v31 = vpop.f32.mrf.mxu1 }
 0xd33   :  { %v1580_v32 = vadd.f32 %v2943_v36, %v1579_v31  ;;  %v1423_v33 = vpop.xlane.xlu2 %1422 }
 0xd34   :  { %v1425_v34 = vsub.f32 %v1416_v23, %v1423_v33 }
 0xd35   :  { %v1610_v28 = vsel %vm215_vm8, %v1580_v32, -inf }
 0xd36   :  { %v1428_v60 = vmul.f32 1.442695, %v1425_v34  ;;  %1611 = vmax.xlane.f32.xlu0 %v1610_v28  ;;  %v2289_v34 = vld [vmem:[%s3175_s7 + $0x38] sm:$0xff] }
 0xd38   :  { %2403 = vpow2.f32 %v1428_v60 }
 0xd3b   :  { %v1585_v0 = vpop.permute.xlu2 %1584 }
 0xd3c   :  { %2276 = vmatpush.xpose.msk.msrb.mxu2 %vm215_vm8, %v1585_v0 }
 0xd3e   :  { %v2404_v37 = vpop.eup %2403 }
 0xd3f   :  { %v1433_v38 = vsel %vm215_vm8, %v2404_v37, 0.0 }
 0xd40   :  { %1434 = vadd.xlane.f32.xlu2 %v1433_v38 }
 0xd4a   :  { %1582 = vrot.lane.b32.xlu0 %v2951_v9, %s2439_s3 }
 0xd58   :  { %1717 = vrot.lane.b32.xlu2 %v2913_v22, %s2440_s23 }
 0xd60   :  { %1632 = vrot.lane.b32.xlu2 %v2911_v54, %s2439_s3 }
 0xd68   :  { %1747 = vrot.lane.b32.xlu2 %v2947_v40, %s2440_s23 }
 0xd77   :  { %v1357_v39 = vpop.f32.mrf.mxu2 }
 0xd78   :  { %2273 = vmatmul.msk.f32.gmra.mxu0 %vm215_vm8, %v1357_v39 }
 0xda9   :  { %v1612_v42 = vpop.xlane.xlu0 %1611 }
 0xdaa   :  { %v1616_v44 = vsub.f32 %v1580_v32, %v1612_v42 }
 0xdac   :  { %v1618_v45 = vmul.f32 1.442695, %v1616_v44 }
 0xdae   :  { %2405 = vpow2.f32 %v1618_v45 }
 0xdb3   :  { %v1435_v47 = vpop.xlane.xlu2 %1434 }
 0xdb4   :  { %v2406_v49 = vpop.eup %2405  ;;  %2407 = vrcp.f32 %v1435_v47 }
 0xdb5   :  { %v1622_v9 = vsel %vm215_vm8, %v2406_v49, 0.0 }
 0xdb6   :  { %1623 = vadd.xlane.f32.xlu0 %v1622_v9  ;;  %v2334_v9 = vld [vmem:[%s3176_s8 + $0x1] ss:$0 sm:$0xff] }
 0xdba   :  { %v2408_v22 = vpop.eup %2407 }
 0xdbb   :  { %v1439_v50 = vmul.f32 %v2408_v22, %v2404_v37  ;;  %v1718_v52 = vpop.permute.xlu2 %1717 }
 0xdbc   :  { %2284 = vmatmul.msk.f32.vlgmr.msrb.gmra.mxu0 %vm215_vm8, %v1718_v52  ;;  %v1583_v53 = vpop.permute.xlu0 %1582 }
 0xdbd   :  { %2268 = vmatmul.msk.f32.vlgmr.msra.gmra.mxu2 %vm215_vm8, %v1439_v50 }
 0xdc3   :  { %v1633_v40 = vpop.permute.xlu2 %1632 }
 0xdc4   :  { %1653 = vmatpush.msrb.mxu1 %v1633_v40 }
 0xdc5   :  { %2277 = vmatmul.msk.f32.vlgmr.msrb.gmra.mxu2 %vm215_vm8, %v1583_v53 }
 0xdcb   :  { %v1748_v14 = vpop.permute.xlu2 %1747 }
 0xdcc   :  { %2285 = vmatpush.xpose.msk.msra.mxu1 %vm215_vm8, %v1748_v14 }
 0xdf5   :  { %v3026_v59 = vpop.f32.mrf.mxu0 }
 0xe29   :  { %v1624_v4 = vpop.xlane.xlu0 %1623 }
 0xe2a   :  { %2409 = vrcp.f32 %v1624_v4 }
 0xe30   :  { %v2410_v56 = vpop.eup %2409 }
 0xe31   :  { %v1630_v61 = vmul.f32 %v2410_v56, %v2406_v49 }
 0xe33   :  { %2278 = vmatmul.msk.f32.vlgmr.msrb.gmra.mxu1 %vm215_vm8, %v1630_v61 }
 0xe34   :  { %1870 = vmatpush.msrb.mxu1 %v2289_v34 }
 0xe39   :  { %v1742_v43 = vpop.f32.mrf.mxu0 }
 0xe3a   :  { %v1743_v51 = vadd.f32 %v2943_v36, %v1742_v43  ;;  %v2280_v36 = vld [vmem:[%s3175_s7 + $0x30] sm:$0xff] }
 0xe3b   :  { %2286 = vmatmul.msk.f32.vlgmr.msra.gmra.mxu1 %vm215_vm8, %v1746_v46  ;;  %1707 = vmatpush.msra.mxu3 %v2280_v36  ;;  %v2295_v36 = vld [vmem:[%s3180_s11 + $0x20] sm:$0xff] }
 0xe3c   :  { %v1773_v62 = vsel %vm215_vm8, %v1743_v51, -inf }
 0xe3d   :  { %1774 = vmax.xlane.f32.xlu1 %v1773_v62 }
 0xe40   :  { %v1491_v63 = vpop.f32.mrf.mxu2 }
 0xe41   :  { %2271 = vmatmul.msk.f32.gmra.mxu3 %vm215_vm8, %v1491_v63 }
 0xe48   :  { %v1607_v1 = vpop.f32.mrf.mxu2 }
 0xe49   :  { %v1608_v2 = vadd.f32 %v2974_v57, %v1607_v1 }
 0xe4b   :  { %v1613_v3 = vsel %vm215_vm8, %v1608_v2, -inf }
 0xe4c   :  { %1614 = vmax.xlane.f32.xlu2 %v1613_v3  ;;  %v2297_v3 = vld [vmem:[%s3180_s11 + $0x30] sm:$0xff] }
 0xe64   :  { %1795 = vrot.lane.b32.xlu2 %v2911_v54, %s2440_s23 }
 0xeb0   :  { %v1655_v5 = vpop.f32.mrf.mxu1  ;;  %v1775_v6 = vpop.xlane.xlu1 %1774 }
 0xeb1   :  { %2281 = vmatmul.msk.f32.vlgmr.msra.gmra.mxu3 %vm215_vm8, %v1655_v5  ;;  %v1779_v11 = vsub.f32 %v1743_v51, %v1775_v6 }
 0xeb3   :  { %v1781_v13 = vmul.f32 1.442695, %v1779_v11 }
 0xeb8   :  { %v1770_v18 = vpop.f32.mrf.mxu1 }
 0xeb9   :  { %v1771_v19 = vadd.f32 %v2974_v57, %v1770_v18 }
 0xebb   :  { %v1776_v20 = vsel %vm215_vm8, %v1771_v19, -inf }
 0xebf   :  { %v1615_v7 = vpop.xlane.xlu2 %1614 }
 0xec0   :  { %v1617_v8 = vsub.f32 %v1608_v2, %v1615_v7 }
 0xec2   :  { %v1620_v12 = vmul.f32 1.442695, %v1617_v8 }
 0xec4   :  { %2411 = vpow2.f32 %v1620_v12 }
 0xec5   :  { %2413 = vpow2.f32 %v1781_v13 }
 0xec7   :  { %v1796_v31 = vpop.permute.xlu2 %1795 }
 0xeca   :  { %v2412_v16 = vpop.eup %2411 }
 0xecb   :  { %v1625_v48 = vsel %vm215_vm8, %v2412_v16, 0.0  ;;  %v2414_v54 = vpop.eup %2413 }
 0xecc   :  { %1626 = vadd.xlane.f32.xlu0 %v1625_v48  ;;  %v1785_v17 = vsel %vm215_vm8, %v2414_v54, 0.0 }
 0xed4   :  { %1786 = vadd.xlane.f32.xlu0 %v1785_v17 }
 0xedc   :  { %1777 = vmax.xlane.f32.xlu0 %v1776_v20 }
 0xef0   :  { %1658 = vrot.lane.b32.xlu0 %v2949_v41, %s2439_s3 }
 0xf3f   :  { %v1627_v21 = vpop.xlane.xlu0 %1626 }
 0xf47   :  { %v1787_v23 = vpop.xlane.xlu0 %1786 }
 0xf4f   :  { %v1778_v24 = vpop.xlane.xlu0 %1777 }
 0xf50   :  { %v1780_v25 = vsub.f32 %v1771_v19, %v1778_v24 }
 0xf52   :  { %v1783_v26 = vmul.f32 1.442695, %v1780_v25  ;;  %v2336_v25 = vld [vmem:[%s3178_s10 + $0x1] ss:$0 sm:$0xff] }
 0xf54   :  { %2415 = vpow2.f32 %v1783_v26 }
 0xf55   :  { %2417 = vrcp.f32 %v1627_v21  ;;  %v2335_v21 = vld [vmem:[%s3177_s9 + $0x1] ss:$0 sm:$0xff] }
 0xf56   :  { %2419 = vrcp.f32 %v1787_v23 }
 0xf5a   :  { %v2416_v27 = vpop.eup %2415 }
 0xf5b   :  { %v1788_v29 = vsel %vm215_vm8, %v2416_v27, 0.0  ;;  %v2418_v30 = vpop.eup %2417 }
 0xf5c   :  { %1789 = vadd.xlane.f32.xlu1 %v1788_v29  ;;  %v1631_v57 = vmul.f32 %v2418_v30, %v2412_v16  ;;  %v2420_v32 = vpop.eup %2419 }
 0xf5d   :  { %v1793_v33 = vmul.f32 %v2420_v32, %v2414_v54 }
 0xf62   :  { %v1659_v55 = vpop.permute.xlu0 %1658 }
 0xf63   :  { %1679 = vmatpush.msra.mxu2 %v1659_v55 }
 0xf64   :  { %2279 = vmatmul.msk.f32.vlgmr.msra.gmra.mxu2 %vm215_vm8, %v1631_v57 }
 0xf65   :  { %1816 = vmatpush.msrb.mxu2 %v1796_v31 }
 0xf6c   :  { %2287 = vmatmul.msk.f32.vlgmr.msrb.gmra.mxu2 %vm215_vm8, %v1793_v33 }
 0xf75   :  { %1821 = vrot.lane.b32.xlu1 %v2949_v41, %s2440_s23  ;;  %v1519_v41 = vpop.f32.mrf.mxu3 }
 0xf76   :  { %v1549_v47 = vadd.f32 %v3024_v58, %v1519_v41 }
 0xf7d   :  { %v1522_v42 = vpop.f32.mrf.mxu3 }
 0xf7e   :  { %v1552_v4 = vadd.f32 %v3026_v59, %v1522_v42  ;;  %v2298_v59 = vld [vmem:[%s3180_s11 + $0x38] sm:$0xff] }
 0xf7f   :  { %1975 = vmatpush.msra.mxu2 %v2298_v59 }
 0xf81   :  { %1976 = vmatpush.msra.mxu2 %v2297_v3 }
 0xf85   :  { %v1709_v45 = vpop.f32.mrf.mxu3 }
 0xf86   :  { %v1715_v49 = vadd.f32 %v1709_v45, %v1549_v47 }
 0xfcf   :  { %v1790_v28 = vpop.xlane.xlu1 %1789 }
 0xfd0   :  { %2421 = vrcp.f32 %v1790_v28 }
 0xfd6   :  { %v2422_v60 = vpop.eup %2421 }
 0xfd7   :  { %v1794_v0 = vmul.f32 %v2422_v60, %v2416_v27 }
 0xfe7   :  { %v1822_v37 = vpop.permute.xlu1 %1821  ;;  %v1681_v38 = vpop.f32.mrf.mxu2 }
 0xfe8   :  { %2282 = vmatmul.msk.f32.gmra.mxu3 %vm215_vm8, %v1681_v38  ;;  %1842 = vmatpush.msra.mxu0 %v1822_v37 }
 0xfe9   :  { %2288 = vmatmul.msk.f32.vlgmr.msra.gmra.mxu0 %vm215_vm8, %v1794_v0 }
 0xfef   :  { %v1818_v39 = vpop.f32.mrf.mxu2 }
 0xff0   :  { %2290 = vmatmul.msk.f32.vlgmr.msrb.gmra.mxu1 %vm215_vm8, %v1818_v39  ;;  %v3103_v39 = vld [vmem:[%s3179_s12 + $0x1] ss:$0 sm:$0xff] }
0x1066   :  { %v1844_v44 = vpop.f32.mrf.mxu0 }
0x1067   :  { %2291 = vmatmul.msk.f32.gmra.mxu1 %vm215_vm8, %v1844_v44 }
0x106b   :  { %v1712_v14 = vpop.f32.mrf.mxu3 }
0x106c   :  { %v1716_v56 = vadd.f32 %v1712_v14, %v1552_v4 }
0x106d   :  { %v1872_v22 = vpop.f32.mrf.mxu1 }
0x106e   :  { %v1878_v50 = vadd.f32 %v1872_v22, %v1715_v49  ;;  %v2311_v49 = vld [vmem:[%s3182_s13 + $0x78] sm:$0xff] }
0x106f   :  { %2102 = vmatpush.msrb.mxu3 %v2311_v49 }
0x1070   :  { %v1885_v52 = vadd.f32 %v2334_v9, %v1878_v50  ;;  %v2310_v50 = vld [vmem:[%s3182_s13 + $0x70] sm:$0xff] }
0x1071   :  { %2103 = vmatpush.msrb.mxu3 %v2310_v50 }
0x1072   :  { %v1887_v40 = vadd.f32 %v1885_v52, %v2894_v15 }
0x1074   :  { %v1893_v53 = vsel %vm64_vm0, %v1887_v40, 0.0 }
0x1075   :  { %1894 = vadd.xlane.f32.xlu0 %v1893_v53  ;;  %v2309_v53 = vld [vmem:[%s3182_s13 + $0x68] sm:$0xff] }
0x1076   :  { %2104 = vmatpush.msrb.mxu3 %v2309_v53 }
0x10e4   :  { %v1875_v61 = vpop.f32.mrf.mxu1 }
0x10e5   :  { %v1879_v43 = vadd.f32 %v1875_v61, %v1716_v56  ;;  %v2308_v56 = vld [vmem:[%s3182_s13 + $0x60] sm:$0xff] }
0x10e6   :  { %2105 = vmatpush.msrb.mxu3 %v2308_v56 }
0x10e7   :  { %v1886_v58 = vadd.f32 %v2334_v9, %v1879_v43 }
0x10e8   :  { %v1895_v46 = vpop.xlane.xlu0 %1894 }
0x10e9   :  { %v1899_v51 = vmul.f32 %v1895_v46, %v2544_v10  ;;  %v1888_v62 = vadd.f32 %v1886_v58, %v2925_v35  ;;  %v2296_v35 = vld [vmem:[%s3180_s11 + $0x28] sm:$0xff]  ;;  %v2307_v58 = vld [vmem:[%s3182_s13 + $0x58] sm:$0xff] }
0x10ea   :  { %1977 = vmatpush.msra.mxu2 %v2296_v35  ;;  %2106 = vmatpush.msrb.mxu3 %v2307_v58 }
0x10eb   :  { %v1901_v63 = vsub.f32 %v1887_v40, %v1899_v51  ;;  %v1896_v1 = vsel %vm64_vm0, %v1888_v62, 0.0  ;;  %v2306_v51 = vld [vmem:[%s3182_s13 + $0x50] sm:$0xff] }
0x10ec   :  { %1897 = vadd.xlane.f32.xlu2 %v1896_v1  ;;  %1978 = vmatpush.msra.mxu2 %v2295_v36  ;;  %v2305_v1 = vld [vmem:[%s3182_s13 + $0x48] sm:$0xff] }
0x10ed   :  { %v1903_v15 = vmul.f32 %v1901_v63, %v1901_v63  ;;  %2107 = vmatpush.msrb.mxu3 %v2306_v51 }
0x10ef   :  { %v1905_v2 = vsel %vm64_vm0, %v1903_v15, 0.0  ;;  %v2304_v15 = vld [vmem:[%s3182_s13 + $0x40] sm:$0xff]  ;;  %2108 = vmatpush.msrb.mxu3 %v2305_v1 }
0x10f0   :  { %1906 = vadd.xlane.f32.xlu1 %v1905_v2 }
0x10f1   :  { %2109 = vmatpush.msrb.mxu3 %v2304_v15 }
0x115f   :  { %v1898_v5 = vpop.xlane.xlu2 %1897 }
0x1160   :  { %v1900_v6 = vmul.f32 %v1898_v5, %v2544_v10 }
0x1162   :  { %v1902_v7 = vsub.f32 %v1888_v62, %v1900_v6 }
0x1163   :  { %v1907_v8 = vpop.xlane.xlu1 %1906 }
0x1164   :  { %v1911_v11 = vmul.f32 %v1907_v8, %v2544_v10  ;;  %v1904_v12 = vmul.f32 %v1902_v7, %v1902_v7 }
0x1166   :  { %v1913_v13 = vadd.f32 1e-12, %v1911_v11  ;;  %v1908_v16 = vsel %vm64_vm0, %v1904_v12, 0.0 }
0x1167   :  { %1909 = vadd.xlane.f32.xlu0 %v1908_v16 }
0x1168   :  { %2423 = vrsqrt.f32 %v1913_v13  ;;  %vm1921_vm1 = vweird.f32 %v1913_v13 }
0x116e   :  { %v2424_v48 = vpop.eup %2423 }
0x116f   :  { %v1916_v54 = vmul.f32 %v2424_v48, %v1913_v13  ;;  %vm1922_vm8 = vweird.f32 %v2424_v48 }
0x1170   :  { %vm1923_vm2 = vmor %vm1921_vm1, %vm1922_vm8 }
0x1171   :  { %v1917_v17 = vmul.f32 %v2424_v48, %v1916_v54 }
0x1173   :  { %v1918_v18 = vmul.f32 0.5, %v1917_v17 }
0x1175   :  { %v1919_v19 = vsub.f32 1.5, %v1918_v18 }
0x1177   :  { %v1920_v20 = vmul.f32 %v2424_v48, %v1919_v19 }
0x1179   :  { %v1924_v23 = vsel %vm1923_vm2, %v2424_v48, %v1920_v20 }
0x117a   :  { %v1935_v24 = vmul.f32 %v1924_v23, %v1901_v63 }
0x117c   :  { %v1940_v26 = vmul.f32 %v2335_v21, %v1935_v24 }
0x117e   :  { %v3091_v27 = vadd.f32 %v2336_v25, %v1940_v26 }
0x1180   :  { %2300 = vmatmul.msk.f32.vlgmr.msra.gmra.mxu2 %vm64_vm0, %v3091_v27 }
0x11da   :  { %v1910_v29 = vpop.xlane.xlu0 %1909 }
0x11db   :  { %v1912_v30 = vmul.f32 %v1910_v29, %v2544_v10 }
0x11dd   :  { %v1914_v57 = vadd.f32 1e-12, %v1912_v30 }
0x11df   :  { %2425 = vrsqrt.f32 %v1914_v57  ;;  %vm1931_vm5 = vweird.f32 %v1914_v57 }
0x11e5   :  { %v2426_v55 = vpop.eup %2425 }
0x11e6   :  { %v1926_v31 = vmul.f32 %v2426_v55, %v1914_v57  ;;  %vm1932_vm4 = vweird.f32 %v2426_v55 }
0x11e7   :  { %vm1933_vm6 = vmor %vm1931_vm5, %vm1932_vm4 }
0x11e8   :  { %v1927_v32 = vmul.f32 %v2426_v55, %v1926_v31 }
0x11ea   :  { %v1928_v33 = vmul.f32 0.5, %v1927_v32 }
0x11ec   :  { %v1929_v34 = vsub.f32 1.5, %v1928_v33 }
0x11ee   :  { %v1930_v28 = vmul.f32 %v2426_v55, %v1929_v34 }
0x11f0   :  { %v1934_v60 = vsel %vm1933_vm6, %v2426_v55, %v1930_v28 }
0x11f1   :  { %v1936_v0 = vmul.f32 %v1934_v60, %v1902_v7 }
0x11f3   :  { %v1941_v37 = vmul.f32 %v2335_v21, %v1936_v0 }
0x11f5   :  { %v3096_v38 = vadd.f32 %v2336_v25, %v1941_v37 }
0x11f7   :  { %2301 = vmatmul.msk.f32.gmra.mxu2 %vm64_vm0, %v3096_v38 }
0x1203   :  { %v1980_v41 = vpop.f32.mrf.mxu2 }
0x1204   :  { %v1981_v42 = vadd.f32 %v3103_v39, %v1980_v41 }
0x1206   :  { %v1988_v44 = vmul.f32 0.70710677, %v1981_v42  ;;  %v1986_v25 = vmul.f32 0.5, %v1981_v42 }
0x1208   :  { %v1990_v45 = vmul.f32 %v1988_v44, %v1988_v44 }
0x120a   :  { %v1991_v47 = vmin.f32 %v1990_v45, 16.0 }
0x120c   :  { %v1992_v9 = vmul.f32 2.1237322e-06, %v1991_v47  ;;  %v2003_v22 = vmul.f32 3.8918573e-05, %v1991_v47 }
0x120e   :  { %v1993_v52 = vadd.f32 0.00028619796, %v1992_v9  ;;  %v2004_v40 = vadd.f32 0.001143296, %v2003_v22 }
0x1210   :  { %v1994_v14 = vmul.f32 %v1993_v52, %v1991_v47  ;;  %v2005_v4 = vmul.f32 %v2004_v40, %v1991_v47 }
0x1212   :  { %v2006_v61 = vadd.f32 0.014752088, %v2005_v4  ;;  %v1995_v43 = vadd.f32 0.0036580483, %v1994_v14 }
0x1214   :  { %v2007_v46 = vmul.f32 %v2006_v61, %v1991_v47  ;;  %v1996_v63 = vmul.f32 %v1995_v43, %v1991_v47 }
0x1216   :  { %v2008_v62 = vadd.f32 0.112945676, %v2007_v46  ;;  %v1997_v3 = vadd.f32 0.05243302, %v1996_v63 }
0x1218   :  { %v2009_v2 = vmul.f32 %v2008_v62, %v1991_v47  ;;  %v1998_v5 = vmul.f32 %v1997_v3, %v1991_v47 }
0x121a   :  { %v2010_v59 = vadd.f32 0.4994258, %v2009_v2  ;;  %v1999_v6 = vadd.f32 0.18741608, %v1998_v5  ;;  %v2338_v5 = vld [vmem:[%s3181_s14 + $0x1] ss:$0 sm:$0xff] }
0x121c   :  { %v2011_v35 = vmul.f32 %v2010_v59, %v1991_v47  ;;  %v2000_v8 = vmul.f32 %v1999_v6, %v1991_v47 }
0x121e   :  { %v2012_v36 = vadd.f32 1.0, %v2011_v35  ;;  %v2001_v16 = vadd.f32 1.1283791, %v2000_v8 }
0x1220   :  { %2427 = vrcp.f32 %v2012_v36  ;;  %v2024_v13 = vand.u32 2147483648, %v2012_v36  ;;  %v2022_v54 = vand.u32 2147483647, %v2012_v36  ;;  %vm2018_vm9 = vweird.f32 %v2012_v36 }
0x1221   :  { %v2002_v19 = vmul.f32 %v2001_v16, %v1988_v44 }
0x1222   :  { %v2025_v18 = vor.u32 1.1754944e-38, %v2024_v13  ;;  %vm2023_vm11 = vcmp.eq.f32.partialorder %v2022_v54, 8.507059e+37 }
0x1226   :  { %v2428_v7 = vpop.eup %2427 }
0x1227   :  { %v2014_v11 = vmul.f32 %v2428_v7, %v2012_v36  ;;  %vm2019_vm7 = vweird.f32 %v2428_v7 }
0x1228   :  { %vm2020_vm10 = vmor %vm2018_vm9, %vm2019_vm7 }
0x1229   :  { %v2015_v12 = vsub.f32 1.0, %v2014_v11 }
0x122b   :  { %v2016_v48 = vmul.f32 %v2428_v7, %v2015_v12 }
0x122d   :  { %v2017_v17 = vadd.f32 %v2428_v7, %v2016_v48 }
0x122f   :  { %v2021_v20 = vsel %vm2020_vm10, %v2428_v7, %v2017_v17 }
0x1230   :  { %v2026_v21 = vsel %vm2023_vm11, %v2025_v18, %v2021_v20 }
0x1231   :  { %v2027_v23 = vmul.f32 %v2026_v21, %v2002_v19 }
0x1233   :  { %v2302_v24 = vclamps-f32 %v2027_v23, 1.0 }
0x1235   :  { %v2070_v26 = vadd.f32 1.0, %v2302_v24 }
0x1237   :  { %v2072_v29 = vmul.f32 %v2070_v26, %v1986_v25 }
0x1239   :  { %2313 = vmatmul.msk.f32.vlgmr.msrb.gmra.mxu3 %vm1056_vm3, %v2072_v29 }
0x127a   :  { %v1983_v30 = vpop.f32.mrf.mxu2 }
0x127b   :  { %v1984_v57 = vadd.f32 %v3103_v39, %v1983_v30 }
0x127d   :  { %v1989_v55 = vmul.f32 0.70710677, %v1984_v57  ;;  %v1987_v3 = vmul.f32 0.5, %v1984_v57 }
0x127f   :  { %v2030_v31 = vmul.f32 %v1989_v55, %v1989_v55 }
0x1281   :  { %v2031_v32 = vmin.f32 %v2030_v31, 16.0 }
0x1283   :  { %v2032_v33 = vmul.f32 2.1237322e-06, %v2031_v32  ;;  %v2043_v34 = vmul.f32 3.8918573e-05, %v2031_v32 }
0x1285   :  { %v2033_v28 = vadd.f32 0.00028619796, %v2032_v33  ;;  %v2044_v60 = vadd.f32 0.001143296, %v2043_v34  ;;  %v2339_v34 = vld [vmem:[%s3184_s15 + $0x1] ss:$0 sm:$0xff] }
0x1287   :  { %v2034_v0 = vmul.f32 %v2033_v28, %v2031_v32  ;;  %v2045_v37 = vmul.f32 %v2044_v60, %v2031_v32  ;;  %v2340_v60 = vld [vmem:[%s3185_s16 + $0x1] ss:$0 sm:$0xff] }
0x1289   :  { %v2046_v41 = vadd.f32 0.014752088, %v2045_v37  ;;  %v2035_v44 = vadd.f32 0.0036580483, %v2034_v0 }
0x128b   :  { %v2047_v45 = vmul.f32 %v2046_v41, %v2031_v32  ;;  %v2036_v47 = vmul.f32 %v2035_v44, %v2031_v32 }
0x128d   :  { %v2048_v42 = vadd.f32 0.112945676, %v2047_v45  ;;  %v2037_v22 = vadd.f32 0.05243302, %v2036_v47 }
0x128f   :  { %v2049_v49 = vmul.f32 %v2048_v42, %v2031_v32  ;;  %v2038_v39 = vmul.f32 %v2037_v22, %v2031_v32 }
0x1291   :  { %v2050_v9 = vadd.f32 0.4994258, %v2049_v49  ;;  %v2039_v40 = vadd.f32 0.18741608, %v2038_v39 }
0x1293   :  { %v2051_v50 = vmul.f32 %v2050_v9, %v2031_v32  ;;  %v2040_v14 = vmul.f32 %v2039_v40, %v2031_v32 }
0x1295   :  { %v2052_v52 = vadd.f32 1.0, %v2051_v50  ;;  %v2041_v43 = vadd.f32 1.1283791, %v2040_v14 }
0x1297   :  { %2429 = vrcp.f32 %v2052_v52  ;;  %v2064_v61 = vand.u32 2147483648, %v2052_v52  ;;  %v2062_v46 = vand.u32 2147483647, %v2052_v52  ;;  %vm2058_vm13 = vweird.f32 %v2052_v52 }
0x1298   :  { %v2042_v63 = vmul.f32 %v2041_v43, %v1989_v55 }
0x1299   :  { %v2065_v62 = vor.u32 1.1754944e-38, %v2064_v61  ;;  %vm2063_vm15 = vcmp.eq.f32.partialorder %v2062_v46, 8.507059e+37 }
0x129d   :  { %v2430_v53 = vpop.eup %2429 }
0x129e   :  { %v2054_v4 = vmul.f32 %v2430_v53, %v2052_v52  ;;  %vm2059_vm12 = vweird.f32 %v2430_v53 }
0x129f   :  { %vm2060_vm14 = vmor %vm2058_vm13, %vm2059_vm12 }
0x12a0   :  { %v2055_v56 = vsub.f32 1.0, %v2054_v4 }
0x12a2   :  { %v2056_v58 = vmul.f32 %v2430_v53, %v2055_v56 }
0x12a4   :  { %v2057_v51 = vadd.f32 %v2430_v53, %v2056_v58 }
0x12a6   :  { %v2061_v1 = vsel %vm2060_vm14, %v2430_v53, %v2057_v51 }
0x12a7   :  { %v2066_v15 = vsel %vm2063_vm15, %v2065_v62, %v2061_v1 }
0x12a8   :  { %v2067_v2 = vmul.f32 %v2066_v15, %v2042_v63 }
0x12aa   :  { %v2303_v59 = vclamps-f32 %v2067_v2, 1.0 }
0x12ac   :  { %v2071_v35 = vadd.f32 1.0, %v2303_v59 }
0x12ae   :  { %v2073_v36 = vmul.f32 %v2071_v35, %v1987_v3 }
0x12b0   :  { %2314 = vmatmul.msk.f32.gmra.mxu3 %vm1056_vm3, %v2073_v36 }
0x12bc   :  { %v2111_v6 = vpop.f32.mrf.mxu3 }
0x12bd   :  { %v2112_v7 = vadd.f32 %v2338_v5, %v2111_v6 }
0x12bf   :  { %2319 = vst.msk [vmem:[%s3183_s18 + $0x10] sm:$0xff] %vm64_vm0, %v2112_v7  ;;  %v2117_v8 = vadd.f32 %v2112_v7, %v3091_v27 }
0x12c1   :  { %v2123_v11 = vsel %vm64_vm0, %v2117_v8, 0.0 }
0x12c2   :  { %2124 = vadd.xlane.f32.xlu2 %v2123_v11 }
0x1333   :  { %v2114_v12 = vpop.f32.mrf.mxu3 }
0x1334   :  { %v2115_v13 = vadd.f32 %v2338_v5, %v2114_v12 }
0x1335   :  { %v2125_v16 = vpop.xlane.xlu2 %2124 }
0x1336   :  { %2320 = vst.msk [vmem:[%s3183_s18 + $0x18] sm:$0xff] %vm64_vm0, %v2115_v13  ;;  %v2129_v48 = vmul.f32 %v2125_v16, %v2544_v10  ;;  %v2118_v54 = vadd.f32 %v2115_v13, %v3096_v38 }
0x1338   :  { %v2131_v17 = vsub.f32 %v2117_v8, %v2129_v48  ;;  %v2126_v18 = vsel %vm64_vm0, %v2118_v54, 0.0 }
0x1339   :  { %2127 = vadd.xlane.f32.xlu0 %v2126_v18 }
0x133a   :  { %v2133_v27 = vmul.f32 %v2131_v17, %v2131_v17 }
0x133c   :  { %v2135_v19 = vsel %vm64_vm0, %v2133_v27, 0.0 }
0x133d   :  { %2136 = vadd.xlane.f32.xlu2 %v2135_v19 }
0x13ac   :  { %v2128_v20 = vpop.xlane.xlu0 %2127 }
0x13ad   :  { %v2130_v21 = vmul.f32 %v2128_v20, %v2544_v10 }
0x13af   :  { %v2132_v23 = vsub.f32 %v2118_v54, %v2130_v21 }
0x13b0   :  { %v2137_v24 = vpop.xlane.xlu2 %2136 }
0x13b1   :  { %v2141_v25 = vmul.f32 %v2137_v24, %v2544_v10  ;;  %v2134_v26 = vmul.f32 %v2132_v23, %v2132_v23 }
0x13b3   :  { %v2143_v29 = vadd.f32 1e-12, %v2141_v25  ;;  %v2138_v30 = vsel %vm64_vm0, %v2134_v26, 0.0 }
0x13b4   :  { %2139 = vadd.xlane.f32.xlu0 %v2138_v30 }
0x13b5   :  { %2431 = vrsqrt.f32 %v2143_v29  ;;  %vm2151_vm8 = vweird.f32 %v2143_v29 }
0x13bb   :  { %v2432_v38 = vpop.eup %2431 }
0x13bc   :  { %v2146_v57 = vmul.f32 %v2432_v38, %v2143_v29  ;;  %vm2152_vm3 = vweird.f32 %v2432_v38 }
0x13bd   :  { %vm2153_vm1 = vmor %vm2151_vm8, %vm2152_vm3 }
0x13be   :  { %v2147_v55 = vmul.f32 %v2432_v38, %v2146_v57 }
0x13c0   :  { %v2148_v31 = vmul.f32 0.5, %v2147_v55 }
0x13c2   :  { %v2149_v32 = vsub.f32 1.5, %v2148_v31 }
0x13c4   :  { %v2150_v33 = vmul.f32 %v2432_v38, %v2149_v32 }
0x13c6   :  { %v2154_v28 = vsel %vm2153_vm1, %v2432_v38, %v2150_v33 }
0x13c7   :  { %v2165_v0 = vmul.f32 %v2154_v28, %v2131_v17 }
0x13c9   :  { %v2170_v37 = vmul.f32 %v2339_v34, %v2165_v0 }
0x13cb   :  { %v2175_v41 = vadd.f32 %v2340_v60, %v2170_v37 }
0x13cd   :  { %2317 = vst.msk [vmem:[%s3186_s17 + $0x10] sm:$0xff] %vm64_vm0, %v2175_v41 }
0x1427   :  { %v2140_v44 = vpop.xlane.xlu0 %2139 }
0x1428   :  { %v2142_v45 = vmul.f32 %v2140_v44, %v2544_v10 }
0x142a   :  { %v2144_v42 = vadd.f32 1e-12, %v2142_v45 }
0x142c   :  { %2433 = vrsqrt.f32 %v2144_v42  ;;  %vm2161_vm4 = vweird.f32 %v2144_v42 }
0x1432   :  { %v2434_v47 = vpop.eup %2433 }
0x1433   :  { %v2156_v49 = vmul.f32 %v2434_v47, %v2144_v42  ;;  %vm2162_vm2 = vweird.f32 %v2434_v47 }
0x1434   :  { %vm2163_vm5 = vmor %vm2161_vm4, %vm2162_vm2 }
0x1435   :  { %v2157_v9 = vmul.f32 %v2434_v47, %v2156_v49 }
0x1437   :  { %v2158_v22 = vmul.f32 0.5, %v2157_v9 }
0x1439   :  { %v2159_v50 = vsub.f32 1.5, %v2158_v22 }
0x143b   :  { %v2160_v52 = vmul.f32 %v2434_v47, %v2159_v50 }
0x143d   :  { %v2164_v39 = vsel %vm2163_vm5, %v2434_v47, %v2160_v52 }
0x143e   :  { %v2166_v40 = vmul.f32 %v2164_v39, %v2132_v23 }
0x1440   :  { %v2171_v53 = vmul.f32 %v2339_v34, %v2166_v40 }
0x1442   :  { %v2176_v14 = vadd.f32 %v2340_v60, %v2171_v53 }
0x1444   :  { %2318 = vst.msk [vmem:[%s3186_s17 + $0x18] sm:$0xff] %vm64_vm0, %v2176_v14 }

</bundles_post_ra>
